<compile_context>
chip_gen: v7x
topology: tpu7x:2x2x1
jax: 0.10.0
libtpu: 0.0.40
codegen_flags: <defaults>
</compile_context>

<pallas_src>
import functools

import numpy as np

import jax
import jax.numpy as jnp
from jax.experimental import pallas as pl
from jax.experimental.pallas import tpu as pltpu


def _mix_kernel(t1_ref, t2_ref, v1_ref, v2_ref, p1_ref, p2_ref, b_ref, m_ref,
                o_ref, fp1_ref, fp2_ref, *, H, W, eps, pad):
    """One program = one batch sample, all C output channels.

    t1_ref, t2_ref : (1, C, H*W)  flat input planes (lane-dense)
    v1_ref, v2_ref : (C, 9)       per-input-channel folded 3x3 weights
    p1_ref, p2_ref : (C, C)       0/1 pairing matrices (concat channel -> out channel)
    b_ref          : (C, 1)       conv bias
    m_ref          : (9, 1, H*W)  boundary-validity mask per tap (0./1.)
    o_ref          : (1, C, H*W)  normalized output (lane-dense store)
    fp1/fp2_ref    : (C, H*W + 2*pad) f32 VMEM scratch: zero-padded flat planes
    """
    HW = H * W

    # Hoisted f32 upcast (once per input, not per tap).
    x1 = t1_ref[0].astype(jnp.float32)          # (C, HW)
    x2 = t2_ref[0].astype(jnp.float32)

    # In-kernel halo padding (replaces wrapper-side concat+pad): zero the scratch,
    # then store the plane at a lane-aligned offset (pad is a multiple of 128).
    zeros = jnp.zeros(fp1_ref.shape, jnp.float32)
    fp1_ref[...] = zeros
    fp2_ref[...] = zeros
    fp1_ref[:, pad:pad + HW] = x1
    fp2_ref[:, pad:pad + HW] = x2

    C = x1.shape[0]
    s1 = jnp.zeros((C, HW), jnp.float32)        # per-T1-channel conv partial sums
    s2 = jnp.zeros((C, HW), jnp.float32)        # per-T2-channel conv partial sums

    # 3x3 shifted-tap conv on the VPU, fully vectorized over channels and lanes.
    t = 0
    for dh in (-1, 0, 1):
        for dw in (-1, 0, 1):
            sh = dh * W + dw
            tap1 = fp1_ref[:, pad + sh: pad + sh + HW]   # (C, HW) shifted window
            tap2 = fp2_ref[:, pad + sh: pad + sh + HW]
            m = m_ref[t]                                  # (1, HW) edge mask
            w1 = v1_ref[:, t:t + 1]                       # (C, 1) lane-broadcast
            w2 = v2_ref[:, t:t + 1]
            s1 = s1 + (tap1 * w1) * m
            s2 = s2 + (tap2 * w2) * m
            t += 1

    # Pair concat channels (2c, 2c+1) into output channel c with tiny 0/1 matmuls,
    # then add the conv bias.
    acc = (jnp.dot(p1_ref[...], s1, preferred_element_type=jnp.float32,
                   precision=jax.lax.Precision.HIGHEST)
           + jnp.dot(p2_ref[...], s2, preferred_element_type=jnp.float32,
                     precision=jax.lax.Precision.HIGHEST)
           + b_ref[...])                                  # (C, HW)

    # InstanceNorm2d (affine=False): per-channel mean / biased variance over H*W.
    inv_n = 1.0 / HW
    mean = jnp.sum(acc, axis=1, keepdims=True) * inv_n
    centered = acc - mean
    var = jnp.sum(centered * centered, axis=1, keepdims=True) * inv_n
    o_ref[0] = (centered * jax.lax.rsqrt(var + eps)).astype(o_ref.dtype)


def mix_block(feat_T1, feat_T2, weight, bias, eps=1e-5):
    """feat_T1, feat_T2: (B, C, H, W); weight: (C, 2, 3, 3); bias: (C,)."""
    B, C, H, W = feat_T1.shape
    HW = H * W
    PAD = 128  # lane-aligned halo for the flat shifted-tap reads (>= W + 1)

    # ---- tiny weight-only rearrangements (no image-sized HBM traffic) ----------
    # concat channel j carries weight[j // 2, j % 2]; j = i for T1[i], j = C + i
    # for T2[i]; output channel j // 2 receives its contribution.
    w9 = weight.reshape(C, 2, 9).astype(jnp.float32)
    j1 = np.arange(C)
    j2 = C + np.arange(C)
    v1 = w9[j1 // 2, j1 % 2]                     # (C, 9) weights applied to T1[i]
    v2 = w9[j2 // 2, j2 % 2]                     # (C, 9) weights applied to T2[i]
    p1 = np.zeros((C, C), np.float32)
    p1[j1 // 2, np.arange(C)] = 1.0              # T1[i] -> out channel i//2
    p2 = np.zeros((C, C), np.float32)
    p2[j2 // 2, np.arange(C)] = 1.0              # T2[i] -> out channel (C+i)//2
    b_col = bias.reshape(C, 1).astype(jnp.float32)

    # Boundary-validity masks of the 9 flat shifts (constant, 9*H*W floats).
    pp = np.arange(HW)
    hh, ww = pp // W, pp % W
    masks = np.zeros((9, 1, HW), np.float32)
    t = 0
    for dh in (-1, 0, 1):
        for dw in (-1, 0, 1):
            masks[t, 0] = ((hh + dh >= 0) & (hh + dh < H) &
                           (ww + dw >= 0) & (ww + dw < W)).astype(np.float32)
            t += 1

    # Free, contiguous flattening of spatial dims -> lane-dense (B, C, H*W) blocks.
    t1f = feat_T1.reshape(B, C, HW)
    t2f = feat_T2.reshape(B, C, HW)

    kernel = functools.partial(_mix_kernel, H=H, W=W, eps=eps, pad=PAD)

    out_flat = pl.pallas_call(
        kernel,
        out_shape=jax.ShapeDtypeStruct((B, C, HW), feat_T1.dtype),
        grid=(B,),
        in_specs=[
            pl.BlockSpec((1, C, HW), lambda b: (b, 0, 0)),     # T1 (flat)
            pl.BlockSpec((1, C, HW), lambda b: (b, 0, 0)),     # T2 (flat)
            pl.BlockSpec((C, 9), lambda b: (0, 0)),            # v1
            pl.BlockSpec((C, 9), lambda b: (0, 0)),            # v2
            pl.BlockSpec((C, C), lambda b: (0, 0)),            # pairing P1
            pl.BlockSpec((C, C), lambda b: (0, 0)),            # pairing P2
            pl.BlockSpec((C, 1), lambda b: (0, 0)),            # bias
            pl.BlockSpec((9, 1, HW), lambda b: (0, 0, 0)),     # tap masks
        ],
        out_specs=pl.BlockSpec((1, C, HW), lambda b: (b, 0, 0)),
        scratch_shapes=[
            pltpu.VMEM((C, HW + 2 * PAD), jnp.float32),        # padded T1 planes
            pltpu.VMEM((C, HW + 2 * PAD), jnp.float32),        # padded T2 planes
        ],
        compiler_params=pltpu.CompilerParams(
            dimension_semantics=("parallel",),
            vmem_limit_bytes=32 * 1024 * 1024),  # fits v7x 64 MiB VMEM comfortably
    )(t1f, t2f, v1, v2, jnp.asarray(p1), jnp.asarray(p2), b_col,
      jnp.asarray(masks))

    return out_flat.reshape(B, C, H, W)


def _reference(feat_T1, feat_T2, weight, bias, eps=1e-5):
    C = feat_T1.shape[1]
    x = jnp.concatenate([feat_T1, feat_T2], axis=1)
    y = jax.lax.conv_general_dilated(
        x, weight, window_strides=(1, 1), padding=((1, 1), (1, 1)),
        dimension_numbers=("NCHW", "OIHW", "NCHW"), feature_group_count=C,
        precision=jax.lax.Precision.HIGHEST)
    y = y + bias[None, :, None, None]
    mean = y.mean(axis=(2, 3), keepdims=True)
    var = ((y - mean) ** 2).mean(axis=(2, 3), keepdims=True)
    return (y - mean) / jnp.sqrt(var + eps)


if __name__ == "__main__":
    B, C, H, W = 2, 4, 16, 16
    key = jax.random.PRNGKey(0)
    k1, k2, k3, k4 = jax.random.split(key, 4)

    feat_T1 = jax.random.normal(k1, (B, C, H, W), jnp.float32)
    feat_T2 = jax.random.normal(k2, (B, C, H, W), jnp.float32)

    # Conv2d(2C, C, kernel_size=3, padding=1, groups=C): weight (C, 2, 3, 3), bias (C,)
    fan_in = 2 * 3 * 3
    bound = 1.0 / (fan_in ** 0.5)
    weight = jax.random.uniform(k3, (C, 2, 3, 3), jnp.float32, -bound, bound)
    bias = jax.random.uniform(k4, (C,), jnp.float32, -bound, bound)

    out = jax.block_until_ready(mix_block(feat_T1, feat_T2, weight, bias))

    ref = _reference(feat_T1, feat_T2, weight, bias)
    max_err = float(jnp.max(jnp.abs(out - ref)))
    assert jnp.allclose(out, ref, atol=1e-4, rtol=1e-4), f"max abs err = {max_err}"

    print("KERNEL_OK")
</pallas_src>

<mosaic_0001>
module attributes {stable_mosaic.version = 11 : i64} {
  func.func @_mix_kernel(%arg0: i32, %arg1: memref<1x4x256xf32, #tpu.memory_space<vmem>>, %arg2: memref<1x4x256xf32, #tpu.memory_space<vmem>>, %arg3: memref<4x9xf32, #tpu.memory_space<vmem>>, %arg4: memref<4x9xf32, #tpu.memory_space<vmem>>, %arg5: memref<4x4xf32, #tpu.memory_space<vmem>>, %arg6: memref<4x4xf32, #tpu.memory_space<vmem>>, %arg7: memref<4x1xf32, #tpu.memory_space<vmem>>, %arg8: memref<9x1x256xf32, #tpu.memory_space<vmem>>, %arg9: memref<1x4x256xf32, #tpu.memory_space<vmem>>, %arg10: memref<4x512xf32, #tpu.memory_space<vmem>>, %arg11: memref<4x512xf32, #tpu.memory_space<vmem>>) attributes {dimension_semantics = [#tpu.dimension_semantics<parallel>], iteration_bounds = array<i64: 2>, scalar_prefetch = 0 : i64, scratch_operands = 2 : i64, tpu.core_type = #tpu.core_type<tc>, window_params = [{transform_indices = @transform_0, window_bounds = array<i64: 1, 4, 256>}, {transform_indices = @transform_1, window_bounds = array<i64: 1, 4, 256>}, {pipeline_mode = #tpu.pipeline_mode<synchronous>, transform_indices = @transform_2, window_bounds = array<i64: 4, 9>}, {pipeline_mode = #tpu.pipeline_mode<synchronous>, transform_indices = @transform_3, window_bounds = array<i64: 4, 9>}, {pipeline_mode = #tpu.pipeline_mode<synchronous>, transform_indices = @transform_4, window_bounds = array<i64: 4, 4>}, {pipeline_mode = #tpu.pipeline_mode<synchronous>, transform_indices = @transform_5, window_bounds = array<i64: 4, 4>}, {pipeline_mode = #tpu.pipeline_mode<synchronous>, transform_indices = @transform_6, window_bounds = array<i64: 4, 1>}, {pipeline_mode = #tpu.pipeline_mode<synchronous>, transform_indices = @transform_7, window_bounds = array<i64: 9, 1, 256>}, {transform_indices = @transform_8, window_bounds = array<i64: 1, 4, 256>}]} {
    %c0 = arith.constant 0 : index
    %c0_0 = arith.constant 0 : index
    %c0_1 = arith.constant 0 : index
    %0 = vector.load %arg1[%c0, %c0_0, %c0_1] : memref<1x4x256xf32, #tpu.memory_space<vmem>>, vector<1x4x256xf32>
    %1 = vector.shape_cast %0 : vector<1x4x256xf32> to vector<4x256xf32>
    %c0_2 = arith.constant 0 : index
    %c0_3 = arith.constant 0 : index
    %c0_4 = arith.constant 0 : index
    %2 = vector.load %arg2[%c0_2, %c0_3, %c0_4] : memref<1x4x256xf32, #tpu.memory_space<vmem>>, vector<1x4x256xf32>
    %3 = vector.shape_cast %2 : vector<1x4x256xf32> to vector<4x256xf32>
    %cst = arith.constant 0.000000e+00 : f32
    %4 = vector.broadcast %cst : f32 to vector<4x512xf32>
    %c0_5 = arith.constant 0 : index
    %c0_6 = arith.constant 0 : index
    %5 = vector.load %arg10[%c0_5, %c0_6] : memref<4x512xf32, #tpu.memory_space<vmem>>, vector<4x512xf32>
    tpu.vector_store %arg10[%c0_5, %c0_6], %4 {strides = array<i32>} : memref<4x512xf32, #tpu.memory_space<vmem>>, vector<4x512xf32>,
    %c0_7 = arith.constant 0 : index
    %c0_8 = arith.constant 0 : index
    %6 = vector.load %arg11[%c0_7, %c0_8] : memref<4x512xf32, #tpu.memory_space<vmem>>, vector<4x512xf32>
    tpu.vector_store %arg11[%c0_7, %c0_8], %4 {strides = array<i32>} : memref<4x512xf32, #tpu.memory_space<vmem>>, vector<4x512xf32>,
    %c0_9 = arith.constant 0 : index
    %c128 = arith.constant 128 : index
    %7 = vector.load %arg10[%c0_9, %c128] : memref<4x512xf32, #tpu.memory_space<vmem>>, vector<4x256xf32>
    tpu.vector_store %arg10[%c0_9, %c128], %1 {strides = array<i32>} : memref<4x512xf32, #tpu.memory_space<vmem>>, vector<4x256xf32>,
    %c0_10 = arith.constant 0 : index
    %c128_11 = arith.constant 128 : index
    %8 = vector.load %arg11[%c0_10, %c128_11] : memref<4x512xf32, #tpu.memory_space<vmem>>, vector<4x256xf32>
    tpu.vector_store %arg11[%c0_10, %c128_11], %3 {strides = array<i32>} : memref<4x512xf32, #tpu.memory_space<vmem>>, vector<4x256xf32>,
    %cst_12 = arith.constant 0.000000e+00 : f32
    %9 = vector.broadcast %cst_12 : f32 to vector<4x256xf32>
    %cst_13 = arith.constant 0.000000e+00 : f32
    %10 = vector.broadcast %cst_13 : f32 to vector<4x256xf32>
    %c0_14 = arith.constant 0 : index
    %c111 = arith.constant 111 : index
    %11 = vector.load %arg10[%c0_14, %c111] : memref<4x512xf32, #tpu.memory_space<vmem>>, vector<4x256xf32>
    %c0_15 = arith.constant 0 : index
    %c111_16 = arith.constant 111 : index
    %12 = vector.load %arg11[%c0_15, %c111_16] : memref<4x512xf32, #tpu.memory_space<vmem>>, vector<4x256xf32>
    %c0_17 = arith.constant 0 : index
    %c0_18 = arith.constant 0 : index
    %c0_19 = arith.constant 0 : index
    %13 = vector.load %arg8[%c0_17, %c0_18, %c0_19] : memref<9x1x256xf32, #tpu.memory_space<vmem>>, vector<1x1x256xf32>
    %14 = vector.shape_cast %13 : vector<1x1x256xf32> to vector<1x256xf32>
    %c0_20 = arith.constant 0 : index
    %c0_21 = arith.constant 0 : index
    %15 = vector.load %arg3[%c0_20, %c0_21] : memref<4x9xf32, #tpu.memory_space<vmem>>, vector<4x1xf32>
    %c0_22 = arith.constant 0 : index
    %c0_23 = arith.constant 0 : index
    %16 = vector.load %arg4[%c0_22, %c0_23] : memref<4x9xf32, #tpu.memory_space<vmem>>, vector<4x1xf32>
    %17 = vector.broadcast %15 : vector<4x1xf32> to vector<4x256xf32>
    %18 = arith.mulf %11, %17 : vector<4x256xf32>
    %19 = vector.broadcast %14 : vector<1x256xf32> to vector<4x256xf32>
    %20 = arith.mulf %18, %19 : vector<4x256xf32>
    %21 = arith.addf %9, %20 : vector<4x256xf32>
    %22 = vector.broadcast %16 : vector<4x1xf32> to vector<4x256xf32>
    %23 = arith.mulf %12, %22 : vector<4x256xf32>
    %24 = vector.broadcast %14 : vector<1x256xf32> to vector<4x256xf32>
    %25 = arith.mulf %23, %24 : vector<4x256xf32>
    %26 = arith.addf %10, %25 : vector<4x256xf32>
    %c0_24 = arith.constant 0 : index
    %c112 = arith.constant 112 : index
    %27 = vector.load %arg10[%c0_24, %c112] : memref<4x512xf32, #tpu.memory_space<vmem>>, vector<4x256xf32>
    %c0_25 = arith.constant 0 : index
    %c112_26 = arith.constant 112 : index
    %28 = vector.load %arg11[%c0_25, %c112_26] : memref<4x512xf32, #tpu.memory_space<vmem>>, vector<4x256xf32>
    %c1 = arith.constant 1 : index
    %c0_27 = arith.constant 0 : index
    %c0_28 = arith.constant 0 : index
    %29 = vector.load %arg8[%c1, %c0_27, %c0_28] : memref<9x1x256xf32, #tpu.memory_space<vmem>>, vector<1x1x256xf32>
    %30 = vector.shape_cast %29 : vector<1x1x256xf32> to vector<1x256xf32>
    %c0_29 = arith.constant 0 : index
    %c1_30 = arith.constant 1 : index
    %31 = vector.load %arg3[%c0_29, %c1_30] : memref<4x9xf32, #tpu.memory_space<vmem>>, vector<4x1xf32>
    %c0_31 = arith.constant 0 : index
    %c1_32 = arith.constant 1 : index
    %32 = vector.load %arg4[%c0_31, %c1_32] : memref<4x9xf32, #tpu.memory_space<vmem>>, vector<4x1xf32>
    %33 = vector.broadcast %31 : vector<4x1xf32> to vector<4x256xf32>
    %34 = arith.mulf %27, %33 : vector<4x256xf32>
    %35 = vector.broadcast %30 : vector<1x256xf32> to vector<4x256xf32>
    %36 = arith.mulf %34, %35 : vector<4x256xf32>
    %37 = arith.addf %21, %36 : vector<4x256xf32>
    %38 = vector.broadcast %32 : vector<4x1xf32> to vector<4x256xf32>
    %39 = arith.mulf %28, %38 : vector<4x256xf32>
    %40 = vector.broadcast %30 : vector<1x256xf32> to vector<4x256xf32>
    %41 = arith.mulf %39, %40 : vector<4x256xf32>
    %42 = arith.addf %26, %41 : vector<4x256xf32>
    %c0_33 = arith.constant 0 : index
    %c113 = arith.constant 113 : index
    %43 = vector.load %arg10[%c0_33, %c113] : memref<4x512xf32, #tpu.memory_space<vmem>>, vector<4x256xf32>
    %c0_34 = arith.constant 0 : index
    %c113_35 = arith.constant 113 : index
    %44 = vector.load %arg11[%c0_34, %c113_35] : memref<4x512xf32, #tpu.memory_space<vmem>>, vector<4x256xf32>
    %c2 = arith.constant 2 : index
    %c0_36 = arith.constant 0 : index
    %c0_37 = arith.constant 0 : index
    %45 = vector.load %arg8[%c2, %c0_36, %c0_37] : memref<9x1x256xf32, #tpu.memory_space<vmem>>, vector<1x1x256xf32>
    %46 = vector.shape_cast %45 : vector<1x1x256xf32> to vector<1x256xf32>
    %c0_38 = arith.constant 0 : index
    %c2_39 = arith.constant 2 : index
    %47 = vector.load %arg3[%c0_38, %c2_39] : memref<4x9xf32, #tpu.memory_space<vmem>>, vector<4x1xf32>
    %c0_40 = arith.constant 0 : index
    %c2_41 = arith.constant 2 : index
    %48 = vector.load %arg4[%c0_40, %c2_41] : memref<4x9xf32, #tpu.memory_space<vmem>>, vector<4x1xf32>
    %49 = vector.broadcast %47 : vector<4x1xf32> to vector<4x256xf32>
    %50 = arith.mulf %43, %49 : vector<4x256xf32>
    %51 = vector.broadcast %46 : vector<1x256xf32> to vector<4x256xf32>
    %52 = arith.mulf %50, %51 : vector<4x256xf32>
    %53 = arith.addf %37, %52 : vector<4x256xf32>
    %54 = vector.broadcast %48 : vector<4x1xf32> to vector<4x256xf32>
    %55 = arith.mulf %44, %54 : vector<4x256xf32>
    %56 = vector.broadcast %46 : vector<1x256xf32> to vector<4x256xf32>
    %57 = arith.mulf %55, %56 : vector<4x256xf32>
    %58 = arith.addf %42, %57 : vector<4x256xf32>
    %c0_42 = arith.constant 0 : index
    %c127 = arith.constant 127 : index
    %59 = vector.load %arg10[%c0_42, %c127] : memref<4x512xf32, #tpu.memory_space<vmem>>, vector<4x256xf32>
    %c0_43 = arith.constant 0 : index
    %c127_44 = arith.constant 127 : index
    %60 = vector.load %arg11[%c0_43, %c127_44] : memref<4x512xf32, #tpu.memory_space<vmem>>, vector<4x256xf32>
    %c3 = arith.constant 3 : index
    %c0_45 = arith.constant 0 : index
    %c0_46 = arith.constant 0 : index
    %61 = vector.load %arg8[%c3, %c0_45, %c0_46] : memref<9x1x256xf32, #tpu.memory_space<vmem>>, vector<1x1x256xf32>
    %62 = vector.shape_cast %61 : vector<1x1x256xf32> to vector<1x256xf32>
    %c0_47 = arith.constant 0 : index
    %c3_48 = arith.constant 3 : index
    %63 = vector.load %arg3[%c0_47, %c3_48] : memref<4x9xf32, #tpu.memory_space<vmem>>, vector<4x1xf32>
    %c0_49 = arith.constant 0 : index
    %c3_50 = arith.constant 3 : index
    %64 = vector.load %arg4[%c0_49, %c3_50] : memref<4x9xf32, #tpu.memory_space<vmem>>, vector<4x1xf32>
    %65 = vector.broadcast %63 : vector<4x1xf32> to vector<4x256xf32>
    %66 = arith.mulf %59, %65 : vector<4x256xf32>
    %67 = vector.broadcast %62 : vector<1x256xf32> to vector<4x256xf32>
    %68 = arith.mulf %66, %67 : vector<4x256xf32>
    %69 = arith.addf %53, %68 : vector<4x256xf32>
    %70 = vector.broadcast %64 : vector<4x1xf32> to vector<4x256xf32>
    %71 = arith.mulf %60, %70 : vector<4x256xf32>
    %72 = vector.broadcast %62 : vector<1x256xf32> to vector<4x256xf32>
    %73 = arith.mulf %71, %72 : vector<4x256xf32>
    %74 = arith.addf %58, %73 : vector<4x256xf32>
    %c0_51 = arith.constant 0 : index
    %c128_52 = arith.constant 128 : index
    %75 = vector.load %arg10[%c0_51, %c128_52] : memref<4x512xf32, #tpu.memory_space<vmem>>, vector<4x256xf32>
    %c0_53 = arith.constant 0 : index
    %c128_54 = arith.constant 128 : index
    %76 = vector.load %arg11[%c0_53, %c128_54] : memref<4x512xf32, #tpu.memory_space<vmem>>, vector<4x256xf32>
    %c4 = arith.constant 4 : index
    %c0_55 = arith.constant 0 : index
    %c0_56 = arith.constant 0 : index
    %77 = vector.load %arg8[%c4, %c0_55, %c0_56] : memref<9x1x256xf32, #tpu.memory_space<vmem>>, vector<1x1x256xf32>
    %78 = vector.shape_cast %77 : vector<1x1x256xf32> to vector<1x256xf32>
    %c0_57 = arith.constant 0 : index
    %c4_58 = arith.constant 4 : index
    %79 = vector.load %arg3[%c0_57, %c4_58] : memref<4x9xf32, #tpu.memory_space<vmem>>, vector<4x1xf32>
    %c0_59 = arith.constant 0 : index
    %c4_60 = arith.constant 4 : index
    %80 = vector.load %arg4[%c0_59, %c4_60] : memref<4x9xf32, #tpu.memory_space<vmem>>, vector<4x1xf32>
    %81 = vector.broadcast %79 : vector<4x1xf32> to vector<4x256xf32>
    %82 = arith.mulf %75, %81 : vector<4x256xf32>
    %83 = vector.broadcast %78 : vector<1x256xf32> to vector<4x256xf32>
    %84 = arith.mulf %82, %83 : vector<4x256xf32>
    %85 = arith.addf %69, %84 : vector<4x256xf32>
    %86 = vector.broadcast %80 : vector<4x1xf32> to vector<4x256xf32>
    %87 = arith.mulf %76, %86 : vector<4x256xf32>
    %88 = vector.broadcast %78 : vector<1x256xf32> to vector<4x256xf32>
    %89 = arith.mulf %87, %88 : vector<4x256xf32>
    %90 = arith.addf %74, %89 : vector<4x256xf32>
    %c0_61 = arith.constant 0 : index
    %c129 = arith.constant 129 : index
    %91 = vector.load %arg10[%c0_61, %c129] : memref<4x512xf32, #tpu.memory_space<vmem>>, vector<4x256xf32>
    %c0_62 = arith.constant 0 : index
    %c129_63 = arith.constant 129 : index
    %92 = vector.load %arg11[%c0_62, %c129_63] : memref<4x512xf32, #tpu.memory_space<vmem>>, vector<4x256xf32>
    %c5 = arith.constant 5 : index
    %c0_64 = arith.constant 0 : index
    %c0_65 = arith.constant 0 : index
    %93 = vector.load %arg8[%c5, %c0_64, %c0_65] : memref<9x1x256xf32, #tpu.memory_space<vmem>>, vector<1x1x256xf32>
    %94 = vector.shape_cast %93 : vector<1x1x256xf32> to vector<1x256xf32>
    %c0_66 = arith.constant 0 : index
    %c5_67 = arith.constant 5 : index
    %95 = vector.load %arg3[%c0_66, %c5_67] : memref<4x9xf32, #tpu.memory_space<vmem>>, vector<4x1xf32>
    %c0_68 = arith.constant 0 : index
    %c5_69 = arith.constant 5 : index
    %96 = vector.load %arg4[%c0_68, %c5_69] : memref<4x9xf32, #tpu.memory_space<vmem>>, vector<4x1xf32>
    %97 = vector.broadcast %95 : vector<4x1xf32> to vector<4x256xf32>
    %98 = arith.mulf %91, %97 : vector<4x256xf32>
    %99 = vector.broadcast %94 : vector<1x256xf32> to vector<4x256xf32>
    %100 = arith.mulf %98, %99 : vector<4x256xf32>
    %101 = arith.addf %85, %100 : vector<4x256xf32>
    %102 = vector.broadcast %96 : vector<4x1xf32> to vector<4x256xf32>
    %103 = arith.mulf %92, %102 : vector<4x256xf32>
    %104 = vector.broadcast %94 : vector<1x256xf32> to vector<4x256xf32>
    %105 = arith.mulf %103, %104 : vector<4x256xf32>
    %106 = arith.addf %90, %105 : vector<4x256xf32>
    %c0_70 = arith.constant 0 : index
    %c143 = arith.constant 143 : index
    %107 = vector.load %arg10[%c0_70, %c143] : memref<4x512xf32, #tpu.memory_space<vmem>>, vector<4x256xf32>
    %c0_71 = arith.constant 0 : index
    %c143_72 = arith.constant 143 : index
    %108 = vector.load %arg11[%c0_71, %c143_72] : memref<4x512xf32, #tpu.memory_space<vmem>>, vector<4x256xf32>
    %c6 = arith.constant 6 : index
    %c0_73 = arith.constant 0 : index
    %c0_74 = arith.constant 0 : index
    %109 = vector.load %arg8[%c6, %c0_73, %c0_74] : memref<9x1x256xf32, #tpu.memory_space<vmem>>, vector<1x1x256xf32>
    %110 = vector.shape_cast %109 : vector<1x1x256xf32> to vector<1x256xf32>
    %c0_75 = arith.constant 0 : index
    %c6_76 = arith.constant 6 : index
    %111 = vector.load %arg3[%c0_75, %c6_76] : memref<4x9xf32, #tpu.memory_space<vmem>>, vector<4x1xf32>
    %c0_77 = arith.constant 0 : index
    %c6_78 = arith.constant 6 : index
    %112 = vector.load %arg4[%c0_77, %c6_78] : memref<4x9xf32, #tpu.memory_space<vmem>>, vector<4x1xf32>
    %113 = vector.broadcast %111 : vector<4x1xf32> to vector<4x256xf32>
    %114 = arith.mulf %107, %113 : vector<4x256xf32>
    %115 = vector.broadcast %110 : vector<1x256xf32> to vector<4x256xf32>
    %116 = arith.mulf %114, %115 : vector<4x256xf32>
    %117 = arith.addf %101, %116 : vector<4x256xf32>
    %118 = vector.broadcast %112 : vector<4x1xf32> to vector<4x256xf32>
    %119 = arith.mulf %108, %118 : vector<4x256xf32>
    %120 = vector.broadcast %110 : vector<1x256xf32> to vector<4x256xf32>
    %121 = arith.mulf %119, %120 : vector<4x256xf32>
    %122 = arith.addf %106, %121 : vector<4x256xf32>
    %c0_79 = arith.constant 0 : index
    %c144 = arith.constant 144 : index
    %123 = vector.load %arg10[%c0_79, %c144] : memref<4x512xf32, #tpu.memory_space<vmem>>, vector<4x256xf32>
    %c0_80 = arith.constant 0 : index
    %c144_81 = arith.constant 144 : index
    %124 = vector.load %arg11[%c0_80, %c144_81] : memref<4x512xf32, #tpu.memory_space<vmem>>, vector<4x256xf32>
    %c7 = arith.constant 7 : index
    %c0_82 = arith.constant 0 : index
    %c0_83 = arith.constant 0 : index
    %125 = vector.load %arg8[%c7, %c0_82, %c0_83] : memref<9x1x256xf32, #tpu.memory_space<vmem>>, vector<1x1x256xf32>
    %126 = vector.shape_cast %125 : vector<1x1x256xf32> to vector<1x256xf32>
    %c0_84 = arith.constant 0 : index
    %c7_85 = arith.constant 7 : index
    %127 = vector.load %arg3[%c0_84, %c7_85] : memref<4x9xf32, #tpu.memory_space<vmem>>, vector<4x1xf32>
    %c0_86 = arith.constant 0 : index
    %c7_87 = arith.constant 7 : index
    %128 = vector.load %arg4[%c0_86, %c7_87] : memref<4x9xf32, #tpu.memory_space<vmem>>, vector<4x1xf32>
    %129 = vector.broadcast %127 : vector<4x1xf32> to vector<4x256xf32>
    %130 = arith.mulf %123, %129 : vector<4x256xf32>
    %131 = vector.broadcast %126 : vector<1x256xf32> to vector<4x256xf32>
    %132 = arith.mulf %130, %131 : vector<4x256xf32>
    %133 = arith.addf %117, %132 : vector<4x256xf32>
    %134 = vector.broadcast %128 : vector<4x1xf32> to vector<4x256xf32>
    %135 = arith.mulf %124, %134 : vector<4x256xf32>
    %136 = vector.broadcast %126 : vector<1x256xf32> to vector<4x256xf32>
    %137 = arith.mulf %135, %136 : vector<4x256xf32>
    %138 = arith.addf %122, %137 : vector<4x256xf32>
    %c0_88 = arith.constant 0 : index
    %c145 = arith.constant 145 : index
    %139 = vector.load %arg10[%c0_88, %c145] : memref<4x512xf32, #tpu.memory_space<vmem>>, vector<4x256xf32>
    %c0_89 = arith.constant 0 : index
    %c145_90 = arith.constant 145 : index
    %140 = vector.load %arg11[%c0_89, %c145_90] : memref<4x512xf32, #tpu.memory_space<vmem>>, vector<4x256xf32>
    %c8 = arith.constant 8 : index
    %c0_91 = arith.constant 0 : index
    %c0_92 = arith.constant 0 : index
    %141 = vector.load %arg8[%c8, %c0_91, %c0_92] : memref<9x1x256xf32, #tpu.memory_space<vmem>>, vector<1x1x256xf32>
    %142 = vector.shape_cast %141 : vector<1x1x256xf32> to vector<1x256xf32>
    %c0_93 = arith.constant 0 : index
    %c8_94 = arith.constant 8 : index
    %143 = vector.load %arg3[%c0_93, %c8_94] : memref<4x9xf32, #tpu.memory_space<vmem>>, vector<4x1xf32>
    %c0_95 = arith.constant 0 : index
    %c8_96 = arith.constant 8 : index
    %144 = vector.load %arg4[%c0_95, %c8_96] : memref<4x9xf32, #tpu.memory_space<vmem>>, vector<4x1xf32>
    %145 = vector.broadcast %143 : vector<4x1xf32> to vector<4x256xf32>
    %146 = arith.mulf %139, %145 : vector<4x256xf32>
    %147 = vector.broadcast %142 : vector<1x256xf32> to vector<4x256xf32>
    %148 = arith.mulf %146, %147 : vector<4x256xf32>
    %149 = arith.addf %133, %148 : vector<4x256xf32>
    %150 = vector.broadcast %144 : vector<4x1xf32> to vector<4x256xf32>
    %151 = arith.mulf %140, %150 : vector<4x256xf32>
    %152 = vector.broadcast %142 : vector<1x256xf32> to vector<4x256xf32>
    %153 = arith.mulf %151, %152 : vector<4x256xf32>
    %154 = arith.addf %138, %153 : vector<4x256xf32>
    %c0_97 = arith.constant 0 : index
    %c0_98 = arith.constant 0 : index
    %155 = vector.load %arg5[%c0_97, %c0_98] : memref<4x4xf32, #tpu.memory_space<vmem>>, vector<4x4xf32>
    %cst_99 = arith.constant dense<0.000000e+00> : vector<4x256xf32>
    %156 = tpu.matmul %155, %149, %cst_99 {dimension_numbers = #tpu.dot_dimension_numbers<[1], [0], [0], [1], [0, 0, 1, 1], [], []>, precision = #tpu.contract_precision<fp32>} : vector<4x4xf32>, vector<4x256xf32>, vector<4x256xf32> -> vector<4x256xf32>
    %c0_100 = arith.constant 0 : index
    %c0_101 = arith.constant 0 : index
    %157 = vector.load %arg6[%c0_100, %c0_101] : memref<4x4xf32, #tpu.memory_space<vmem>>, vector<4x4xf32>
    %cst_102 = arith.constant dense<0.000000e+00> : vector<4x256xf32>
    %158 = tpu.matmul %157, %154, %cst_102 {dimension_numbers = #tpu.dot_dimension_numbers<[1], [0], [0], [1], [0, 0, 1, 1], [], []>, precision = #tpu.contract_precision<fp32>} : vector<4x4xf32>, vector<4x256xf32>, vector<4x256xf32> -> vector<4x256xf32>
    %159 = arith.addf %156, %158 : vector<4x256xf32>
    %c0_103 = arith.constant 0 : index
    %c0_104 = arith.constant 0 : index
    %160 = vector.load %arg7[%c0_103, %c0_104] : memref<4x1xf32, #tpu.memory_space<vmem>>, vector<4x1xf32>
    %161 = vector.broadcast %160 : vector<4x1xf32> to vector<4x256xf32>
    %162 = arith.addf %159, %161 : vector<4x256xf32>
    %cst_105 = arith.constant dense<0.000000e+00> : vector<4xf32>
    %163 = vector.multi_reduction <add>, %162, %cst_105 [1] : vector<4x256xf32> to vector<4xf32>
    %164 = vector.shape_cast %163 : vector<4xf32> to vector<4x1xf32>
    %cst_106 = arith.constant 3.906250e-03 : f32
    %165 = vector.broadcast %cst_106 : f32 to vector<4x1xf32>
    %166 = arith.mulf %164, %165 : vector<4x1xf32>
    %167 = vector.broadcast %166 : vector<4x1xf32> to vector<4x256xf32>
    %168 = arith.subf %162, %167 : vector<4x256xf32>
    %169 = arith.mulf %168, %168 : vector<4x256xf32>
    %cst_107 = arith.constant dense<0.000000e+00> : vector<4xf32>
    %170 = vector.multi_reduction <add>, %169, %cst_107 [1] : vector<4x256xf32> to vector<4xf32>
    %171 = vector.shape_cast %170 : vector<4xf32> to vector<4x1xf32>
    %cst_108 = arith.constant 3.906250e-03 : f32
    %172 = vector.broadcast %cst_108 : f32 to vector<4x1xf32>
    %173 = arith.mulf %171, %172 : vector<4x1xf32>
    %cst_109 = arith.constant 9.99999974E-6 : f32
    %174 = vector.broadcast %cst_109 : f32 to vector<4x1xf32>
    %175 = arith.addf %173, %174 : vector<4x1xf32>
    %176 = math.rsqrt %175 : vector<4x1xf32>
    %177 = vector.broadcast %176 : vector<4x1xf32> to vector<4x256xf32>
    %178 = arith.mulf %168, %177 : vector<4x256xf32>
    %c0_110 = arith.constant 0 : index
    %c0_111 = arith.constant 0 : index
    %c0_112 = arith.constant 0 : index
    %179 = vector.load %arg9[%c0_110, %c0_111, %c0_112] : memref<1x4x256xf32, #tpu.memory_space<vmem>>, vector<1x4x256xf32>
    %180 = vector.shape_cast %179 : vector<1x4x256xf32> to vector<4x256xf32>
    %181 = vector.shape_cast %178 : vector<4x256xf32> to vector<1x4x256xf32>
    tpu.vector_store %arg9[%c0_110, %c0_111, %c0_112], %181 {strides = array<i32>} : memref<1x4x256xf32, #tpu.memory_space<vmem>>, vector<1x4x256xf32>,
    return
  }
  func.func @transform_0(%arg0: i32) -> (i32, i32, i32) {
    %c0_i32 = arith.constant 0 : i32
    %c0_i32_0 = arith.constant 0 : i32
    %c0_i32_1 = arith.constant 0 : i32
    return %arg0, %c0_i32, %c0_i32_0 : i32, i32, i32
  }
  func.func @transform_1(%arg0: i32) -> (i32, i32, i32) {
    %c0_i32 = arith.constant 0 : i32
    %c0_i32_0 = arith.constant 0 : i32
    %c0_i32_1 = arith.constant 0 : i32
    return %arg0, %c0_i32, %c0_i32_0 : i32, i32, i32
  }
  func.func @transform_2(%arg0: i32) -> (i32, i32) {
    %c0_i32 = arith.constant 0 : i32
    %c0_i32_0 = arith.constant 0 : i32
    %c0_i32_1 = arith.constant 0 : i32
    return %c0_i32, %c0_i32_0 : i32, i32
  }
  func.func @transform_3(%arg0: i32) -> (i32, i32) {
    %c0_i32 = arith.constant 0 : i32
    %c0_i32_0 = arith.constant 0 : i32
    %c0_i32_1 = arith.constant 0 : i32
    return %c0_i32, %c0_i32_0 : i32, i32
  }
  func.func @transform_4(%arg0: i32) -> (i32, i32) {
    %c0_i32 = arith.constant 0 : i32
    %c0_i32_0 = arith.constant 0 : i32
    %c0_i32_1 = arith.constant 0 : i32
    return %c0_i32, %c0_i32_0 : i32, i32
  }
  func.func @transform_5(%arg0: i32) -> (i32, i32) {
    %c0_i32 = arith.constant 0 : i32
    %c0_i32_0 = arith.constant 0 : i32
    %c0_i32_1 = arith.constant 0 : i32
    return %c0_i32, %c0_i32_0 : i32, i32
  }
  func.func @transform_6(%arg0: i32) -> (i32, i32) {
    %c0_i32 = arith.constant 0 : i32
    %c0_i32_0 = arith.constant 0 : i32
    %c0_i32_1 = arith.constant 0 : i32
    return %c0_i32, %c0_i32_0 : i32, i32
  }
  func.func @transform_7(%arg0: i32) -> (i32, i32, i32) {
    %c0_i32 = arith.constant 0 : i32
    %c0_i32_0 = arith.constant 0 : i32
    %c0_i32_1 = arith.constant 0 : i32
    %c0_i32_2 = arith.constant 0 : i32
    return %c0_i32, %c0_i32_0, %c0_i32_1 : i32, i32, i32
  }
  func.func @transform_8(%arg0: i32) -> (i32, i32, i32) {
    %c0_i32 = arith.constant 0 : i32
    %c0_i32_0 = arith.constant 0 : i32
    %c0_i32_1 = arith.constant 0 : i32
    return %arg0, %c0_i32, %c0_i32_0 : i32, i32, i32
  }
}

</mosaic_0001>

<bundles_post_ra>
// kernel: tpu_custom_call.1
= control target key start
LH: loop header
LB: loop body
LE: loop exit
PB: predicated region body
PF: predicated region fallthrough
CT: control target
= control target key end

     0   :  { %s3221_s0 = inlined_call_operand.hbm [shape: f32[2,4,256], index: 0, kind: input, shape index: {}]   ;;  %s3222_s1 = inlined_call_operand.hbm [shape: f32[2,4,256], index: 1, kind: input, shape index: {}]   ;;  %s3223_s2 = inlined_call_operand.vmem [shape: f32[4,9], index: 2, kind: input, shape index: {}]   ;;  %s3224_s3 = inlined_call_operand.vmem [shape: f32[4,9], index: 3, kind: input, shape index: {}]   ;;  %s3225_s4 = inlined_call_operand.vmem [shape: f32[4,4], index: 4, kind: input, shape index: {}]   ;;  %s3226_s5 = inlined_call_operand.hbm [shape: f32[4,4], index: 5, kind: input, shape index: {}]   ;;  %s3227_s6 = inlined_call_operand.vmem [shape: f32[4,1], index: 6, kind: input, shape index: {}]   ;;  %s3228_s7 = inlined_call_operand.vmem [shape: f32[9,1,256], index: 7, kind: input, shape index: {}]   ;;  %s3229_s8 = inlined_call_operand.hbm [shape: f32[2,4,256], index: 8, kind: output, shape index: {}]  }
   0x1   :  { %3238 = sst [smem:[#allocation19_spill]] %s3226_s5 }
   0x2   :  { %13 = vsyncpa [#allocation5], 0 }
   0x3   :  { %15 = vsyncpa [#allocation5 + $0x1], 0 }
   0x4   :  { %16 = vsyncpa [#allocation8], 0 }
   0x5   :  { %18 = vsyncpa [#allocation8 + $0x1], 0 }
   0x6   :  { %19 = vsyncpa [#allocation6], 0 }
   0x7   :  { %21 = vsyncpa [#allocation6 + $0x1], 0  ;;  %s2608_s27 = smov 0   ;;  %s2610_s28 = smov 0  }
   0x8   :  { %s2612_s29 = smov 0   ;;  %s2614_s30 = smov 0  }
   0x9 LB: > { %3239 = sst [smem:[#allocation15_spill]] %s2529_s29  ;;  %s2629_s9 = sadd.s32 4294967295, %s2533_s30   ;;  %s2533_s30 = sphi %s2614_s30, %s3263_s30   ;;  %s2529_s29 = sphi %s2612_s29, %s3265_s29   ;;  %s2525_s28 = sphi %s2610_s28, %s3267_s28   ;;  %s2521_s27 = sphi %s2608_s27, %s3266_s27  }
   0xa   : > { %s2215_s10 = sadd.s32 4294967294, %s2533_s30   ;;  %p47_p0 = scmp.ne.s32.totalorder %s2525_s28, %s2521_s27 }
   0xb   : > { %p3230_p1 = scmp.eq.s32.totalorder %s2629_s9, 0  ;;  %p229_p3 = scmp.eq.s32.totalorder %s2215_s10, 1 }
   0xc   : > { %p2216_p5 = scmp.ge.s32.totalorder %s2533_s30, 1  ;;  %p236_p7 = scmp.lt.s32.totalorder %s2533_s30, 3 }
   0xd   : > { %p2638_p4 = por %p3230_p1, %p47_p0  ;;  %p2643_p6 = por %p229_p3, %p47_p0 }
   0xe   : > { %p2648_p8 = pnand %p2216_p5, %p236_p7  ;;  %s2535_s14 = smov [#allocation9]  }
   0xf   : > { %s3240_s11 = scalar_select %p2638_p4, 1, 0 }
  0x10   : > { %s3241_s12 = scalar_select %p2643_p6, 1, 0 }
  0x11   : > { %s3243_s13 = scalar_select %p2648_p8, 1, 0 }
  0x12   : > { %3242 = sst [smem:[#allocation16_spill]] %s3241_s12  ;;  %s258_s15 = sshll.u32 %s2535_s14, 4  ;;  %s259_s15 = int_to_ptr.vmem [resolvable:$true] %s258_s15 }
  0x13   : > { %p2278_p10 = pneg %p2648_p8  ;;  %s2656_s16 = sadd.s32 1, %s2533_s30  }
  0x14   : > { %3244 = sst [smem:[#allocation17_spill]] %s2656_s16  ;;  %s31_s18 = ssub.s32 %s2533_s30, %s2656_s16 }
  0x15   : > { %p2660_p11 = pnand %p2278_p10, %p3230_p1  ;;  %p2666_p12 = scmp.eq.s32.totalorder %s31_s18, 0 }
  0x16   : > { %s34_s20 = sadd.s32 1, %s2529_s29  ;;  %s3247_s5 = sld [smem:[#allocation19_spill]] }
  0x17   : > { %s3246_s19 = scalar_select %p2666_p12, 1, 0 }
  0x18   : > { %p2373_p3 = pneg %p2660_p11 }
  0x1c   : > { %s2371_s23 = scalar_lea.hbm %s3247_s5, 64 }
  0x1d   : > { %p2372_p0 = scmp.ne.s32.totalorder %s3247_s5, %s2371_s23  ;;  %p2378_p10 = scmp.lt.u32.totalorder %s2371_s23, %s3247_s5 }
  0x1f   : > { %p2374_p5 = pnand %p2373_p3, %p2372_p0 }
  0x21   : > { %p2375_p7 = pneg %p2374_p5 }
  0x23   : > { %p2380_p9 = pnand %p2378_p10, %p2375_p7 }
  0x25   : > { %2383 = shalt.err (!%p2380_p9)
}
  0x26   : > { %s2384_s14 = scalar_lea.vmem %s259_s15, 64  ;;  %p2392_p6 = scmp.lt.s32.totalorder %s259_s15, %s259_s15 }
  0x27   : > { %p2385_p1 = scmp.ne.s32.totalorder %s259_s15, %s2384_s14  ;;  %p2393_p4 = scmp.lt.s32.totalorder %s2384_s14, %s2384_s14 }
  0x29   : > { %p2387_p2 = pnand %p2385_p1, %p2373_p3  ;;  %p2394_p8 = por %p2393_p4, %p2392_p6 }
  0x2b   : > { %p2388_p13 = pneg %p2387_p2 }
  0x2d   : > { %p2395_p12 = pnand %p2394_p8, %p2388_p13 }
  0x2f   : > { %2398 = shalt.err (!%p2395_p12)
}
  0x30   : > { %2281 = dma.hbm_to_vmem [thread:$0]  (!%p2660_p11), %s3247_s5, 64, %s259_s15, [#allocation8]  }
  0x31   : > { %p3248_p1 = scmp.ne.s32.totalorder %s3246_s19, 0  ;;  %p42_p2 = scmp.eq.s32.totalorder %s2533_s30, 0 }
  0x32   : > { %p3250_p4 = scmp.ne.s32.totalorder %s2529_s29, %s2525_s28  ;;  %p3251_p6 = scmp.eq.s32.totalorder %s2629_s9, 1 }
  0x33   : > { %s2692_s22 = scalar_select %p3248_p1, %s2529_s29, %s34_s20  }
  0x34   : > { %p2700_p8 = por %p3251_p6, %p3250_p4  ;;  %p2294_p9 = scmp.lt.s32.totalorder %s2533_s30, 2 }
  0x35   : > { %3249 = sst [smem:[#allocation18_spill]] %s2692_s22  ;;  %s275_s23 = sand.u32 1, %s2529_s29  }
  0x36   : > { %s3252_s17 = scalar_select %p2700_p8, 1, 0 }
  0x37   : > { %p3253_p12 = pmov %p3250_p4  ;;  %s2709_s24 = sshll.u32 %s275_s23, 3 }
  0x38   : > { %s2243_s25 = sshll.u32 %s2533_s30, 7  ;;  %s279_s20 = scalar_lea.vmem [#allocation4], %s2709_s24 }
  0x39   : > { %p43_p13 = por %p42_p2, %p3253_p12  ;;  %s2715_s19 = scalar_lea.hbm %s3221_s0, %s2243_s25 }
  0x3a   : > { %s287_s10 = sshll.u32 %s279_s20, 4  ;;  %s2727_s26 = scalar_lea.hbm %s3222_s1, %s2243_s25  ;;  %s2722_s10 = int_to_ptr.vmem [resolvable:$true] %s287_s10 }
  0x3b   : > { %p2718_p11 = pnand %p2294_p9, %p43_p13  ;;  %s276_s15 = scalar_lea.sflag [#allocation5], %s275_s23 }
  0x3c   : > { %s2399_s5 = scalar_lea.hbm %s2715_s19, 128  ;;  %s2404_s29 = scalar_lea.hbm %s3221_s0, 256 }
  0x3d   : > { %p2400_p0 = scmp.ne.s32.totalorder %s2715_s19, %s2399_s5  ;;  %p2401_p3 = pneg %p2718_p11 }
  0x3e   : > { %p2405_p10 = scmp.lt.u32.totalorder %s2715_s19, %s3221_s0  ;;  %p2406_p1 = scmp.lt.u32.totalorder %s2404_s29, %s2399_s5 }
  0x3f   : > { %p2402_p5 = pnand %p2401_p3, %p2400_p0  ;;  %p2408_p4 = scmp.lt.u32.totalorder %s2399_s5, %s2715_s19 }
  0x40   : > { %p2407_p2 = por %p2406_p1, %p2405_p10 }
  0x41   : > { %p2403_p7 = pneg %p2402_p5 }
  0x42   : > { %p2409_p6 = por %p2408_p4, %p2407_p2 }
  0x44   : > { %p2410_p9 = pnand %p2409_p6, %p2403_p7 }
  0x46   : > { %2413 = shalt.err (!%p2410_p9)
}
  0x47   : > { %s2414_s23 = scalar_lea.vmem %s2722_s10, 128  ;;  %s2536_s22 = smov [#allocation4]  }
  0x48   : > { %p2415_p12 = scmp.ne.s32.totalorder %s2722_s10, %s2414_s23  ;;  %s2419_s25 = sshll.u32 %s2536_s22, 4  ;;  %s2420_s25 = int_to_ptr.vmem [resolvable:$false] %s2419_s25 }
  0x49   : > { %s2421_s12 = scalar_lea.vmem %s2420_s25, 256  ;;  %p2422_p5 = scmp.lt.s32.totalorder %s2722_s10, %s2420_s25 }
  0x4a   : > { %p2417_p13 = pnand %p2415_p12, %p2401_p3  ;;  %p2423_p10 = scmp.lt.s32.totalorder %s2421_s12, %s2414_s23 }
  0x4c   : > { %p2418_p0 = pneg %p2417_p13  ;;  %p2424_p1 = por %p2423_p10, %p2422_p5 }
  0x4e   : > { %p2425_p2 = pnand %p2424_p1, %p2418_p0 }
  0x50   : > { %2428 = shalt.err (!%p2425_p2)
}
  0x51   : > { %2285 = dma.hbm_to_vmem [thread:$0]  (!%p2718_p11), %s2715_s19, 128, %s2722_s10, %s276_s15  }
  0x52   : > { %s294_s5 = sand.u32 1, %s2533_s30   ;;  %s298_s29 = scalar_lea.vmem [#allocation7], %s2709_s24 }
  0x53   : > { %s306_s16 = sshll.u32 %s298_s29, 4  ;;  %s295_s18 = scalar_lea.sflag [#allocation8], %s294_s5  ;;  %s307_s16 = int_to_ptr.vmem [resolvable:$true] %s306_s16 }
  0x54   : > { %s2429_s21 = scalar_lea.hbm %s2727_s26, 128  ;;  %s2434_s22 = scalar_lea.hbm %s3222_s1, 256 }
  0x55   : > { %p2430_p7 = scmp.ne.s32.totalorder %s2727_s26, %s2429_s21  ;;  %p2435_p9 = scmp.lt.u32.totalorder %s2727_s26, %s3222_s1 }
  0x56   : > { %p2436_p12 = scmp.lt.u32.totalorder %s2434_s22, %s2429_s21  ;;  %p2438_p0 = scmp.lt.u32.totalorder %s2429_s21, %s2727_s26 }
  0x57   : > { %p2432_p4 = pnand %p2430_p7, %p2401_p3 }
  0x58   : > { %p2437_p13 = por %p2436_p12, %p2435_p9 }
  0x59   : > { %p2433_p6 = pneg %p2432_p4 }
  0x5a   : > { %p2439_p5 = por %p2438_p0, %p2437_p13 }
  0x5c   : > { %p2440_p10 = pnand %p2439_p5, %p2433_p6 }
  0x5e   : > { %2443 = shalt.err (!%p2440_p10)
}
  0x5f   : > { %s2444_s24 = scalar_lea.vmem %s307_s16, 128  ;;  %s2537_s19 = smov [#allocation7]  }
  0x60   : > { %p2445_p1 = scmp.ne.s32.totalorder %s307_s16, %s2444_s24  ;;  %s2449_s10 = sshll.u32 %s2537_s19, 4  ;;  %s2450_s10 = int_to_ptr.vmem [resolvable:$false] %s2449_s10 }
  0x61   : > { %s2451_s15 = scalar_lea.vmem %s2450_s10, 256  ;;  %p2452_p4 = scmp.lt.s32.totalorder %s307_s16, %s2450_s10 }
  0x62   : > { %p2447_p2 = pnand %p2445_p1, %p2401_p3  ;;  %p2453_p8 = scmp.lt.s32.totalorder %s2451_s15, %s2444_s24 }
  0x64   : > { %p2448_p7 = pneg %p2447_p2  ;;  %p2454_p9 = por %p2453_p8, %p2452_p4 }
  0x66   : > { %p2455_p12 = pnand %p2454_p9, %p2448_p7 }
  0x68   : > { %2458 = shalt.err (!%p2455_p12)
}
  0x69   : > { %2288 = dma.hbm_to_vmem [thread:$0]  (!%p2718_p11), %s2727_s26, 128, %s307_s16, %s295_s18  }
  0x6a   : > { %p3255_p6 = scmp.ne.s32.totalorder %s3243_s13, 0 }
  0x6b   : > { %s2778_s5 = sand.u32 (!%p3255_p6), 1, %s2525_s28   ;;  %p3256_p8 = scmp.ne.s32.totalorder (!%p3255_p6), %s3240_s11, 0 }
  0x6c   : > { %315 = sbr.rel (%p3255_p6) target bundleno = 1165 (0x48d), region = 52  ;;  %s2781_s29 = sshll.u32 (!%p3255_p6), %s2778_s5, 3 }
  0x6d   : > { %s318_s21 = scalar_lea.sflag (!%p3255_p6), [#allocation5], %s2778_s5  ;;  %s321_s20 = scalar_lea.vmem (!%p3255_p6), [#allocation4], %s2781_s29 }
  0x73   : > { %2504 = dma.done.wait (%p3256_p8), %s318_s21, 128  }
  0x74   : > { %2506 = vsyncadd (%p3256_p8), %s318_s21, 4294967168  ;;  %s326_s13 = sand.u32 1, %s2629_s9   ;;  %s330_s26 = scalar_lea.vmem [#allocation7], %s2781_s29 }
  0x75   : > { %s327_s14 = scalar_lea.sflag [#allocation8], %s326_s13 }
  0x76   : > { %2508 = dma.done.wait (%p3256_p8), %s327_s14, 128  }
  0x77   : > { %2510 = vsyncadd (%p3256_p8), %s327_s14, 4294967168  ;;  %p3257_p11 = scmp.eq.s32.totalorder %s2629_s9, 0 }
  0x79   : > { %2512 = dma.done.wait (%p3257_p11), [#allocation8], 64   ;;  %p3258_p3 = pmov %p3257_p11 }
  0x7a   : > { %v2538_v0 = vmov 2   ;;  %v2539_v1 = vmov 1   ;;  %v2540_v2 = vmov 0.0   ;;  %v394_v3 = vlaneseq  ;;  %v533_v4 = vld [vmem:[%s3223_s2] sm:$0xf]  ;;  %v2841_v15 = vld [vmem:[%s330_s26] sm:$0xff] }
  0x7b   : > { %2514 = vsyncadd (%p3258_p3), [#allocation8], 4294967232  ;;  %2355 = vset.pattern.permute.xlu1 %v2538_v0  ;;  %2354 = vset.pattern.permute.xlu0 %v2539_v1  ;;  %374 = vst [vmem:[#allocation2] sm:$0xff] %v2540_v2  ;;  %v446_v5 = vld [vmem:[%s3223_s2] sm:$0xf]  ;;  %v2541_v16 = vmov 3  }
  0x7c   : > { %375 = vst [vmem:[#allocation2 + $0x8] sm:$0xff] %v2540_v2  ;;  %376 = vst [vmem:[#allocation3] sm:$0xff] %v2540_v2  ;;  %1183 = vmatprep.mubr.f32.mxu1 %v2540_v2  ;;  %1666 = vmatprep.mubr.f32.mxu0 %v2540_v2  ;;  %v534_v6 = vld [vmem:[%s3224_s3] sm:$0xf]  ;;  %v2817_v8 = vshrl.u32 %v394_v3, 7  ;;  %v2542_v21 = vmov 4  }
  0x7d   : > { %377 = vst [vmem:[#allocation3 + $0x8] sm:$0xff] %v2540_v2  ;;  %537 = vperm.xlu1 %2355, %v533_v4   ;;  %450 = vperm.xlu0 %2354, %v446_v5   ;;  %v447_v7 = vld [vmem:[%s3224_s3] sm:$0xf]  ;;  %v2231_v23 = vld [vmem:[%s3228_s7 + $0x4] sm:$0x3]  ;;  %v2543_v27 = vmov 5  }
  0x7e   : > { %v2820_v9 = vsub.s32 0, %v2817_v8  ;;  %v620_v10 = vld [vmem:[%s3224_s3] sm:$0xf]  ;;  %v2829_v12 = vsub.s32 1, %v2817_v8  ;;  %379 = vst [vmem:[#allocation3 + $0x4] sm:$0xff] %v2841_v15  ;;  %s2544_s19 = smov 112  }
  0x7f   : > { %v619_v11 = vld [vmem:[%s3223_s2] sm:$0xf]  ;;  %v2233_v26 = vld [vmem:[%s3228_s7 + $0x8] sm:$0x3]  ;;  %v2234_v35 = vld [vmem:[%s3228_s7 + $0xa] sm:$0x3] }
  0x80   : > { %v2833_v13 = vld [vmem:[%s321_s20] sm:$0xff]  ;;  %v553_v25 = vrot.slane %v2231_v23, %v2820_v9  ;;  %v557_v28 = vrot.slane %v2231_v23, %v2829_v12  ;;  %v720_v29 = vrot.slane %v2233_v26, %v2820_v9  ;;  %v724_v30 = vrot.slane %v2233_v26, %v2829_v12  ;;  %s2546_s18 = smov 113   ;;  %s2548_s10 = smov 1   ;;  %v2237_v60 = vld [vmem:[%s3228_s7 + $0x10] sm:$0x3] }
  0x81   : > { %585 = vperm.xlu1 %2355, %v534_v6   ;;  %499 = vperm.xlu0 %2354, %v447_v7   ;;  %v2230_v14 = vld [vmem:[%s3228_s7 + $0x2] sm:$0x3]  ;;  %378 = vst [vmem:[#allocation2 + $0x4] sm:$0xff] %v2833_v13  ;;  %v2545_v36 = vmov 6   ;;  %v2232_v37 = vld [vmem:[%s3228_s7 + $0x6] sm:$0x3]  ;;  %v786_v38 = vrot.slane %v2234_v35, %v2820_v9  ;;  %v790_v39 = vrot.slane %v2234_v35, %v2829_v12 }
  0x82   : > { %v466_v17 = vrot.slane %v2230_v14, %v2820_v9  ;;  %v470_v18 = vrot.slane %v2230_v14, %v2829_v12  ;;  %v701_v19 = vld [vmem:[%s3223_s2] sm:$0xf]  ;;  %v2869_v32 = vcombine.low %v720_v29, %v724_v30  ;;  %v558_v34 = vcombine.low %v553_v25, %v557_v28  ;;  %v2236_v43 = vld [vmem:[%s3228_s7 + $0xe] sm:$0x3]  ;;  %s2549_s15 = smov 127   ;;  %s2551_s14 = smov 16  }
  0x83   : > { %v702_v20 = vld [vmem:[%s3224_s3] sm:$0xf]  ;;  %v639_v41 = vrot.slane %v2232_v37, %v2820_v9  ;;  %v643_v42 = vrot.slane %v2232_v37, %v2829_v12  ;;  %v2547_v45 = vmov 7   ;;  %v791_v46 = vcombine.low %v786_v38, %v790_v39  ;;  %v2235_v55 = vld [vmem:[%s3228_s7 + $0xc] sm:$0x3]  ;;  %s2555_s16 = smov 111  }
  0x84   : > { %v471_v22 = vcombine.low %v466_v17, %v470_v18  ;;  %v767_v24 = vld [vmem:[%s3224_s3] sm:$0xf]  ;;  %v954_v47 = vrot.slane %v2236_v43, %v2820_v9  ;;  %v958_v48 = vrot.slane %v2236_v43, %v2829_v12  ;;  %v2550_v51 = vmov 0   ;;  %s2560_s26 = smov 95   ;;  %s2561_s23 = smov 94  }
  0x85   : > { %2357 = vset.pattern.permute.xlu1 %v2541_v16  ;;  %2356 = vset.pattern.permute.xlu0 %v2541_v16  ;;  %v766_v31 = vld [vmem:[%s3223_s2] sm:$0xf]  ;;  %v644_v49 = vcombine.low %v639_v41, %v643_v42  ;;  %v2552_v56 = vmov 8   ;;  %v870_v57 = vrot.slane %v2235_v55, %v2820_v9  ;;  %v874_v58 = vrot.slane %v2235_v55, %v2829_v12  ;;  %v443_v37 = vld [vmem:[#allocation3 + $0x8] sm:$0xf]  ;;  %v2948_v43 = vld [vmem:[#allocation3] sm:$0xff] }
  0x86   : > { %669 = vperm.xlu1 %2357, %v620_v10   ;;  %623 = vperm.xlu0 %2356, %v619_v11   ;;  %v851_v33 = vld [vmem:[%s3224_s3] sm:$0xf]  ;;  %v959_v50 = vcombine.low %v954_v47, %v958_v48  ;;  %v1038_v62 = vrot.slane %v2237_v60, %v2820_v9  ;;  %v1042_v63 = vrot.slane %v2237_v60, %v2829_v12  ;;  %v2556_v11 = vmov 839922192   ;;  %s371_s21 = scalar_lea.vmem [#allocation10], %s2781_s29  ;;  %p3259_p0 = scmp.ne.s32.totalorder %s3252_s17, 0 }
  0x87   : > { %v935_v40 = vld [vmem:[%s3224_s3] sm:$0xf]  ;;  %v875_v61 = vcombine.low %v870_v57, %v874_v58  ;;  %v392_v14 = vunpack.c.l.s4 %v2556_v11  ;;  %vm475_vm0 = vcmask 916480   ;;  %vm562_vm1 = vcmask 924672   ;;  %s2113_s13 = sshll.u32 %s371_s21, 4  ;;  %s3179_s13 = int_to_ptr.vmem [resolvable:$true] %s2113_s13 }
  0x88   : > { %v850_v44 = vld [vmem:[%s3223_s2] sm:$0xf]  ;;  %v1043_v0 = vcombine.low %v1038_v62, %v1042_v63  ;;  %v441_v23 = vld [vmem:[#allocation2 + $0x8] sm:$0xf]  ;;  %vm491_vm2 = vcmask 1039360   ;;  %vm795_vm3 = vcmask 7168  }
  0x89   : > { %v934_v52 = vld [vmem:[%s3223_s2] sm:$0xf]  ;;  %v393_v18 = vunpack.c.0.s8 %v392_v14  ;;  %v614_v63 = vld [vmem:[#allocation2 + $0x8] sm:$0xf]  ;;  %vm879_vm4 = vcmask 121856   ;;  %vm963_vm5 = vcmask 130048  }
  0x8a   : > { %2358 = vset.pattern.permute.xlu1 %v2542_v21  ;;  %2359 = vset.pattern.permute.xlu0 %v2542_v21  ;;  %v385_v53 = vld [vmem:[%s3223_s2] sm:$0xf]  ;;  %vm1047_vm6 = vcmask 138240   ;;  %vm414_vm7 = vcmask 908288   ;;  %vm489_vm8 = vcmask 1043456   ;;  %vm577_vm9 = vcmask 1031168  }
  0x8b   : > { %705 = vperm.xlu1 %2358, %v701_v19   ;;  %739 = vperm.xlu0 %2359, %v702_v20   ;;  %v1018_v54 = vld [vmem:[%s3223_s2] sm:$0xf]  ;;  %vm808_vm10 = vcmask 900096   ;;  %vm892_vm11 = vcmask 785408   ;;  %vm976_vm12 = vcmask 777216   ;;  %vm1060_vm13 = vcmask 769024  }
  0x8c   : > { %v1019_v59 = vld [vmem:[%s3224_s3] sm:$0xf]  ;;  %vm1109_vm14 = vcmask 31744  }
  0x8d   : > { %v384_v1 = vld [vmem:[%s3228_s7] sm:$0x3] }
  0x8e   : > { %v405_v3 = vrot.slane %v384_v1, %v2820_v9  ;;  %v409_v4 = vrot.slane %v384_v1, %v2829_v12  ;;  %v386_v5 = vld [vmem:[%s3224_s3] sm:$0xf]  ;;  %v2929_v12 = vsub.s32 %v393_v18, %v2817_v8 }
  0x8f   : > { %2361 = vset.pattern.permute.xlu0 %v2543_v27  ;;  %472 = vrot.lane.b32.xlu1 %v471_v22, %s2544_s19  ;;  %v2936_v30 = vld [vmem:[#allocation2] sm:$0xff] }
  0x90   : > { %817 = vperm.xlu0 %2361, %v767_v24   ;;  %2360 = vset.pattern.permute.xlu1 %v2543_v27  ;;  %v410_v6 = vcombine.low %v405_v3, %v409_v4 }
  0x93   : > { %770 = vperm.xlu1 %2360, %v766_v31  }
  0x94   : > { %2363 = vset.pattern.permute.xlu0 %v2545_v36 }
  0x95   : > { %901 = vperm.xlu0 %2363, %v851_v33  }
  0x97   : > { %559 = vrot.lane.b32.xlu1 %v558_v34, %s2546_s18  ;;  %s2557_s18 = smov 126  }
  0x98   : > { %2362 = vset.pattern.permute.xlu1 %v2545_v36 }
  0x99   : > { %2365 = vset.pattern.permute.xlu0 %v2547_v45 }
  0x9a   : > { %985 = vperm.xlu0 %2365, %v935_v40  }
  0x9b   : > { %854 = vperm.xlu1 %2362, %v850_v44  }
  0x9e   : > { %792 = vrot.lane.b32.xlu0 %v791_v46, %s2548_s10  ;;  %s2553_s10 = smov 15  }
  0x9f   : > { %645 = vrot.lane.b32.xlu1 %v644_v49, %s2549_s15  ;;  %2367 = vset.pattern.permute.xlu0 %v2550_v51 }
  0xa0   : > { %2364 = vset.pattern.permute.xlu1 %v2547_v45  ;;  %v528_v45 = vld [vmem:[#allocation2 + $0x8] sm:$0xf] }
  0xa2   : > { %960 = vrot.lane.b32.xlu0 %v959_v50, %s2551_s14  ;;  %s2554_s14 = smov 17  }
  0xa3   : > { %938 = vperm.xlu1 %2364, %v934_v52  }
  0xa6   : > { %389 = vperm.xlu0 %2367, %v385_v53  }
  0xa7   : > { %2366 = vset.pattern.permute.xlu1 %v2552_v56 }
  0xa8   : > { %1022 = vperm.xlu1 %2366, %v1018_v54   ;;  %v530_v54 = vld [vmem:[#allocation3 + $0x8] sm:$0xf] }
  0xac   : > { %1069 = vperm.xlu1 %2366, %v1019_v59  }
  0xb0   : > { %876 = vrot.lane.b32.xlu1 %v875_v61, %s2553_s10  ;;  %s2245_s10 = sshll.u32 %s2629_s9, 7  ;;  %s2562_s9 = smov [#allocation10]  }
  0xb1   : > { %2368 = vset.pattern.permute.xlu1 %v2550_v51  ;;  %s3177_s11 = scalar_lea.hbm %s3229_s8, %s2245_s10  ;;  %s2463_s29 = sshll.u32 %s2562_s9, 4  ;;  %s2464_s29 = int_to_ptr.vmem [resolvable:$false] %s2463_s29 }
  0xb2   : > { %p2466_p1 = scmp.lt.s32.totalorder %s3179_s13, %s2464_s29 }
  0xb4   : > { %1044 = vrot.lane.b32.xlu1 %v1043_v0, %s2554_s14 }
  0xb8   : > { %424 = vperm.xlu1 %2368, %v386_v5  }
  0xbc   : > { %411 = vrot.lane.b32.xlu1 %v410_v6, %s2555_s16 }
  0xfc   : > { %v538_v7 = vpop.permute.xlu1 %537  ;;  %v451_v10 = vpop.permute.xlu0 %450 }
  0xfd   : > { %v458_v20 = vrot.slane %v451_v10, %v2929_v12  ;;  %v545_v42 = vrot.slane %v538_v7, %v2929_v12  ;;  %v616_v10 = vld [vmem:[#allocation3 + $0x8] sm:$0xf] }
  0xff   : > { %v461_v28 = vmul.f32 %v458_v20, %v441_v23  ;;  %v460_v36 = vmul.f32 %v2936_v30, %v458_v20  ;;  %v548_v50 = vmul.f32 %v545_v42, %v528_v45  ;;  %v547_v53 = vmul.f32 %v545_v42, %v2936_v30 }
 0x100   : > { %v586_v16 = vpop.permute.xlu1 %585  ;;  %v500_v17 = vpop.permute.xlu0 %499 }
 0x101   : > { %v507_v8 = vrot.slane %v500_v17, %v2929_v12  ;;  %v593_v51 = vrot.slane %v586_v16, %v2929_v12 }
 0x103   : > { %v510_v44 = vmul.f32 %v507_v8, %v443_v37  ;;  %v509_v46 = vmul.f32 %v2948_v43, %v507_v8  ;;  %v596_v60 = vmul.f32 %v593_v51, %v530_v54  ;;  %v595_v62 = vmul.f32 %v593_v51, %v2948_v43 }
 0x105   : > { %v670_v19 = vpop.permute.xlu1 %669  ;;  %v624_v9 = vpop.permute.xlu0 %623 }
 0x106   : > { %v631_v61 = vrot.slane %v624_v9, %v2929_v12  ;;  %v677_v5 = vrot.slane %v670_v19, %v2929_v12 }
 0x108   : > { %v634_v6 = vmul.f32 %v631_v61, %v614_v63  ;;  %v633_v11 = vmul.f32 %v631_v61, %v2936_v30  ;;  %v680_v20 = vmul.f32 %v677_v5, %v616_v10  ;;  %v845_v61 = vld [vmem:[#allocation2 + $0xc] sm:$0xf] }
 0x10a   : > { %v706_v21 = vpop.permute.xlu1 %705  ;;  %v740_v22 = vpop.permute.xlu0 %739 }
 0x10b   : > { %v713_v24 = vrot.slane %v706_v21, %v2929_v12  ;;  %v747_v25 = vrot.slane %v740_v22, %v2929_v12  ;;  %v679_v21 = vmul.f32 %v677_v5, %v2948_v43 }
 0x10d   : > { %v715_v26 = vmul.f32 %v713_v24, %v2833_v13  ;;  %v749_v27 = vmul.f32 %v747_v25, %v2841_v15 }
 0x10e   : > { %v473_v29 = vpop.permute.xlu1 %472 }
 0x10f   : > { %v474_v31 = vrot.slane %v473_v29, 4  ;;  %v818_v33 = vpop.permute.xlu0 %817  ;;  %v2940_v34 = vmul.f32 %v749_v27, %v2869_v32  ;;  %v2943_v35 = vmul.f32 %v2869_v32, %v715_v26 }
 0x110   : > { %v825_v19 = vrot.slane %v818_v33, %v2929_v12 }
 0x111   : > { %v476_v38 = vsel %vm475_vm0, %v474_v31, %v473_v29  ;;  %v480_v39 = vmul.f32 %v474_v31, %v461_v28  ;;  %v512_v47 = vmul.f32 %v510_v44, %v474_v31 }
 0x112   : > { %v479_v40 = vmul.f32 %v476_v38, %v460_v36  ;;  %v771_v41 = vpop.permute.xlu1 %770  ;;  %v511_v48 = vmul.f32 %v509_v46, %v476_v38  ;;  %v827_v8 = vmul.f32 %v825_v19, %v2841_v15 }
 0x113   : > { %485 = vrot.lane.b32.xlu1 %v480_v39, %s2549_s15  ;;  %v778_v28 = vrot.slane %v771_v41, %v2929_v12 }
 0x114   : > { %483 = vrot.lane.b32.xlu0 %v479_v40, %s2549_s15  ;;  %v2953_v32 = vpop.permute.xlu0 %901  ;;  %v763_v40 = vld [vmem:[#allocation3 + $0xc] sm:$0xf] }
 0x115   : > { %v780_v36 = vmul.f32 %v778_v28, %v2833_v13  ;;  %v909_v37 = vrot.slane %v2953_v32, %v2929_v12  ;;  %v828_v45 = vmul.f32 %v825_v19, %v763_v40  ;;  %v1015_v19 = vld [vmem:[#allocation3 + $0xc] sm:$0xf] }
 0x116   : > { %v560_v49 = vpop.permute.xlu1 %559 }
 0x117   : > { %v561_v52 = vrot.slane %v560_v49, 4  ;;  %517 = vrot.lane.b32.xlu1 %v512_v47, %s2549_s15 }
 0x118   : > { %515 = vrot.lane.b32.xlu0 %v511_v48, %s2549_s15  ;;  %s2559_s15 = smov 96  }
 0x119   : > { %v563_v55 = vsel %vm562_vm1, %v561_v52, %v560_v49  ;;  %v2959_v56 = vpop.permute.xlu0 %985  ;;  %v567_v57 = vmul.f32 %v561_v52, %v548_v50  ;;  %v598_v1 = vmul.f32 %v596_v60, %v561_v52  ;;  %v847_v60 = vld [vmem:[#allocation3 + $0xc] sm:$0xf] }
 0x11a   : > { %v566_v58 = vmul.f32 %v563_v55, %v547_v53  ;;  %v855_v59 = vpop.permute.xlu1 %854  ;;  %v597_v3 = vmul.f32 %v595_v62, %v563_v55  ;;  %v993_v32 = vrot.slane %v2959_v56, %v2929_v12 }
 0x11b   : > { %572 = vrot.lane.b32.xlu1 %v567_v57, %s2557_s18  ;;  %v862_v38 = vrot.slane %v855_v59, %v2929_v12 }
 0x11c   : > { %570 = vrot.lane.b32.xlu0 %v566_v58, %s2557_s18  ;;  %v995_v53 = vmul.f32 %v993_v32, %v2841_v15 }
 0x11d   : > { %v793_v0 = vpop.permute.xlu0 %792  ;;  %v864_v44 = vmul.f32 %v862_v38, %v2833_v13 }
 0x11e   : > { %v646_v4 = vpop.permute.xlu1 %645  ;;  %v794_v24 = vrot.slane %v793_v0, 4 }
 0x11f   : > { %v647_v7 = vrot.slane %v646_v4, 4  ;;  %603 = vrot.lane.b32.xlu1 %v598_v1, %s2557_s18  ;;  %v912_v1 = vmul.f32 %v909_v37, %v847_v60 }
 0x120   : > { %601 = vrot.lane.b32.xlu0 %v597_v3, %s2557_s18  ;;  %v796_v31 = vsel %vm795_vm3, %v794_v24, %v793_v0  ;;  %v830_v55 = vmul.f32 %v828_v45, %v794_v24  ;;  %s2459_s18 = scalar_lea.vmem %s3179_s13, 128 }
 0x121   : > { %v648_v14 = vsel %vm491_vm2, %v647_v7, %v646_v4  ;;  %v961_v16 = vpop.permute.xlu0 %960  ;;  %v652_v17 = vmul.f32 %v647_v7, %v634_v6  ;;  %v682_v22 = vmul.f32 %v680_v20, %v647_v7  ;;  %v829_v39 = vmul.f32 %v827_v8, %v796_v31  ;;  %p2460_p13 = scmp.ne.s32.totalorder %s3179_s13, %s2459_s18 }
 0x122   : > { %v651_v18 = vmul.f32 %v648_v14, %v633_v11  ;;  %v939_v9 = vpop.permute.xlu1 %938  ;;  %v681_v25 = vmul.f32 %v679_v21, %v648_v14  ;;  %v962_v51 = vrot.slane %v961_v16, 4  ;;  %v865_v4 = vmul.f32 %v862_v38, %v845_v61  ;;  %v931_v11 = vld [vmem:[#allocation3 + $0xc] sm:$0xf]  ;;  %v929_v14 = vld [vmem:[#allocation2 + $0xc] sm:$0xf] }
 0x123   : > { %657 = vrot.lane.b32.xlu1 %v652_v17, %s2544_s19  ;;  %v946_v47 = vrot.slane %v939_v9, %v2929_v12  ;;  %v1013_v21 = vld [vmem:[#allocation2 + $0xc] sm:$0xf]  ;;  %p2461_p5 = pnand %p2460_p13, %p3259_p0 }
 0x124   : > { %655 = vrot.lane.b32.xlu0 %v651_v18, %s2544_s19  ;;  %v964_v58 = vsel %vm963_vm5, %v962_v51, %v961_v16  ;;  %v996_v18 = vmul.f32 %v993_v32, %v931_v11 }
 0x125   : > { %v390_v23 = vpop.permute.xlu0 %389  ;;  %v948_v54 = vmul.f32 %v946_v47, %v2833_v13  ;;  %v997_v0 = vmul.f32 %v995_v53, %v964_v58  ;;  %p2462_p10 = pneg %p2461_p5 }
 0x126   : > { %v2971_v26 = vrot.slane %v390_v23, %v2929_v12 }
 0x127   : > { %v1023_v27 = vpop.permute.xlu1 %1022  ;;  %687 = vrot.lane.b32.xlu1 %v682_v22, %s2544_s19  ;;  %v967_v63 = vmul.f32 %v964_v58, %v948_v54  ;;  %v998_v22 = vmul.f32 %v996_v18, %v962_v51 }
 0x128   : > { %685 = vrot.lane.b32.xlu0 %v681_v25, %s2544_s19  ;;  %v2978_v29 = vmul.f32 %v2936_v30, %v2971_v26  ;;  %v799_v30 = vmul.f32 %v796_v31, %v780_v36  ;;  %s2558_s19 = smov 110   ;;  %v1030_v5 = vrot.slane %v1023_v27, %v2929_v12 }
 0x12a   : > { %v1032_v16 = vmul.f32 %v1030_v5, %v2833_v13 }
 0x12b   : > { %v1070_v33 = vpop.permute.xlu1 %1069  ;;  %752 = vrot.lane.b32.xlu1 %v2940_v34, %s2555_s16  ;;  %v911_v34 = vmul.f32 %v909_v37, %v2841_v15 }
 0x12c   : > { %729 = vrot.lane.b32.xlu0 %v2943_v35, %s2555_s16  ;;  %v761_v35 = vld [vmem:[#allocation2 + $0xc] sm:$0xf]  ;;  %v1077_v6 = vrot.slane %v1070_v33, %v2929_v12  ;;  %s2099_s16 = scalar_lea.sflag [#allocation6], %s2778_s5 }
 0x12d   : > { %v781_v52 = vmul.f32 %v778_v28, %v761_v35 }
 0x12e   : > { %v1079_v17 = vmul.f32 %v1077_v6, %v2841_v15  ;;  %v1080_v25 = vmul.f32 %v1077_v6, %v1015_v19  ;;  %v383_v6 = vld [vmem:[#allocation3 + $0x8] sm:$0xf] }
 0x12f   : > { %v877_v41 = vpop.permute.xlu1 %876  ;;  %833 = vrot.lane.b32.xlu1 %v829_v39, %s2558_s19  ;;  %v800_v57 = vmul.f32 %v794_v24, %v781_v52  ;;  %v1033_v24 = vmul.f32 %v1030_v5, %v1013_v21 }
 0x130   : > { %v878_v42 = vrot.slane %v877_v41, 4  ;;  %803 = vrot.lane.b32.xlu0 %v799_v30, %s2558_s19 }
 0x132   : > { %v880_v46 = vsel %vm879_vm4, %v878_v42, %v877_v41  ;;  %v914_v7 = vmul.f32 %v912_v1, %v878_v42  ;;  %v884_v10 = vmul.f32 %v878_v42, %v865_v4 }
 0x133   : > { %v883_v48 = vmul.f32 %v880_v46, %v864_v44  ;;  %v913_v49 = vmul.f32 %v911_v34, %v880_v46  ;;  %v1045_v50 = vpop.permute.xlu1 %1044 }
 0x134   : > { %v1046_v3 = vrot.slane %v1045_v50, 4 }
 0x135   : > { %917 = vrot.lane.b32.xlu1 %v913_v49, %s2559_s15  ;;  %887 = vrot.lane.b32.xlu0 %v883_v48, %s2559_s15 }
 0x136   : > { %v1082_v13 = vmul.f32 %v1080_v25, %v1046_v3  ;;  %v1052_v15 = vmul.f32 %v1046_v3, %v1033_v24 }
 0x137   : > { %v425_v56 = vpop.permute.xlu1 %424 }
 0x138   : > { %v2999_v59 = vrot.slane %v425_v56, %v2929_v12  ;;  %v949_v12 = vmul.f32 %v946_v47, %v929_v14 }
 0x139   : > { %835 = vrot.lane.b32.xlu1 %v830_v55, %s2558_s19  ;;  %805 = vrot.lane.b32.xlu0 %v800_v57, %s2558_s19  ;;  %s2465_s19 = scalar_lea.vmem %s2464_s29, 256 }
 0x13a   : > { %v3003_v62 = vmul.f32 %v2948_v43, %v2999_v59  ;;  %v1048_v43 = vsel %vm1047_vm6, %v1046_v3, %v1045_v50  ;;  %v968_v23 = vmul.f32 %v962_v51, %v949_v12  ;;  %v435_v12 = vmul.f32 %v2999_v59, %v383_v6  ;;  %p2467_p2 = scmp.lt.s32.totalorder %s2465_s19, %s2459_s18 }
 0x13b   : > { %v1051_v9 = vmul.f32 %v1048_v43, %v1032_v16  ;;  %v1081_v20 = vmul.f32 %v1079_v17, %v1048_v43  ;;  %v412_v27 = vpop.permute.xlu1 %411 }
 0x13c   : > { %v413_v45 = vrot.slane %v412_v27, 4  ;;  %p2468_p7 = por %p2467_p2, %p2466_p1 }
 0x13d   : > { %1001 = vrot.lane.b32.xlu1 %v997_v0, %s2560_s26  ;;  %971 = vrot.lane.b32.xlu0 %v967_v63, %s2560_s26 }
 0x13e   : > { %v415_v50 = vsel %vm414_vm7, %v413_v45, %v412_v27  ;;  %p2469_p4 = pnand %p2468_p7, %p2462_p10 }
 0x13f   : > { %v436_v63 = vmul.f32 %v3003_v62, %v415_v50  ;;  %v381_v62 = vld [vmem:[#allocation2 + $0x8] sm:$0xf] }
 0x140   : > { %v400_v24 = vmul.f32 %v2971_v26, %v381_v62 }
 0x141   : > { %919 = vrot.lane.b32.xlu1 %v914_v7, %s2559_s15  ;;  %889 = vrot.lane.b32.xlu0 %v884_v10, %s2559_s15 }
 0x145   : > { %1085 = vrot.lane.b32.xlu1 %v1081_v20, %s2561_s23  ;;  %1055 = vrot.lane.b32.xlu0 %v1051_v9, %s2561_s23  ;;  %v418_v9 = vmul.f32 %v415_v50, %v2978_v29 }
 0x149   : > { %1003 = vrot.lane.b32.xlu1 %v998_v22, %s2560_s26  ;;  %973 = vrot.lane.b32.xlu0 %v968_v23, %s2560_s26 }
 0x14d   : > { %1087 = vrot.lane.b32.xlu1 %v1082_v13, %s2561_s23  ;;  %1057 = vrot.lane.b32.xlu0 %v1052_v15, %s2561_s23 }
 0x185   : > { %v3012_v28 = vpop.permute.xlu1 %485 }
 0x186   : > { %v484_v8 = vpop.permute.xlu0 %483  ;;  %v488_v51 = vrot.slane %v3012_v28, 4 }
 0x187   : > { %v487_v52 = vrot.slane %v484_v8, 4 }
 0x189   : > { %v3014_v31 = vpop.permute.xlu1 %517  ;;  %v490_v1 = vsel %vm489_vm8, %v487_v52, %v488_v51 }
 0x18a   : > { %v516_v33 = vpop.permute.xlu0 %515  ;;  %v520_v35 = vrot.slane %v3014_v31, 4  ;;  %v492_v16 = vsel %vm491_vm2, %v484_v8, %v490_v1 }
 0x18b   : > { %v519_v46 = vrot.slane %v516_v33, 4  ;;  %v495_v25 = vadd.f32 %v492_v16, %v418_v9 }
 0x18d   : > { %v3016_v36 = vpop.permute.xlu1 %572  ;;  %v521_v53 = vsel %vm489_vm8, %v519_v46, %v520_v35  ;;  %v419_v46 = vmul.f32 %v413_v45, %v400_v24 }
 0x18e   : > { %v571_v37 = vpop.permute.xlu0 %570  ;;  %v575_v57 = vrot.slane %v3016_v36, 4  ;;  %v522_v0 = vsel %vm491_vm2, %v516_v33, %v521_v53 }
 0x18f   : > { %v574_v56 = vrot.slane %v571_v37, 4  ;;  %v525_v10 = vadd.f32 %v522_v0, %v436_v63 }
 0x191   : > { %v3018_v38 = vpop.permute.xlu1 %603  ;;  %v576_v11 = vsel %vm489_vm8, %v574_v56, %v575_v57  ;;  %v496_v57 = vadd.f32 %v3012_v28, %v419_v46 }
 0x192   : > { %v602_v39 = vpop.permute.xlu0 %601  ;;  %v606_v47 = vrot.slane %v3018_v38, 4  ;;  %v578_v19 = vsel %vm577_vm9, %v571_v37, %v576_v11  ;;  %v437_v37 = vmul.f32 %v435_v12, %v413_v45 }
 0x193   : > { %v605_v48 = vrot.slane %v602_v39, 4 }
 0x195   : > { %v3020_v30 = vpop.permute.xlu1 %657  ;;  %v607_v58 = vsel %vm489_vm8, %v605_v48, %v606_v47 }
 0x196   : > { %v656_v40 = vpop.permute.xlu0 %655  ;;  %v660_v3 = vrot.slane %v3020_v30, 4  ;;  %v608_v7 = vsel %vm577_vm9, %v602_v39, %v607_v58  ;;  %v581_v39 = vadd.f32 %v578_v19, %v495_v25 }
 0x197   : > { %v659_v4 = vrot.slane %v656_v40, 4  ;;  %v611_v20 = vadd.f32 %v608_v7, %v525_v10 }
 0x199   : > { %v3022_v41 = vpop.permute.xlu1 %687  ;;  %v661_v21 = vsel %vm489_vm8, %v659_v4, %v660_v3 }
 0x19a   : > { %v686_v42 = vpop.permute.xlu0 %685  ;;  %v690_v54 = vrot.slane %v3022_v41, 4  ;;  %v662_v59 = vsel %vm475_vm0, %v656_v40, %v661_v21 }
 0x19b   : > { %v689_v55 = vrot.slane %v686_v42, 4  ;;  %v665_v47 = vadd.f32 %v662_v59, %v581_v39 }
 0x19d   : > { %v3024_v34 = vpop.permute.xlu1 %752  ;;  %v691_v5 = vsel %vm489_vm8, %v689_v55, %v690_v54 }
 0x19e   : > { %v3026_v44 = vpop.permute.xlu0 %729  ;;  %v692_v17 = vsel %vm475_vm0, %v686_v42, %v691_v5  ;;  %v754_v18 = vrot.slane %v3024_v34, 4 }
 0x19f   : > { %v731_v22 = vrot.slane %v3026_v44, 4  ;;  %v695_v13 = vadd.f32 %v692_v17, %v611_v20 }
 0x1a0   : > { %v755_v29 = vsel %vm414_vm7, %v754_v18, %v3024_v34  ;;  %v526_v34 = vadd.f32 %v3014_v31, %v437_v37  ;;  %v1097_v37 = vld [vmem:[#allocation9] sm:$0xf] }
 0x1a1   : > { %v3032_v49 = vpop.permute.xlu1 %833  ;;  %v732_v26 = vsel %vm414_vm7, %v731_v22, %v3026_v44  ;;  %v758_v48 = vadd.f32 %v755_v29, %v695_v13  ;;  %v1111_v39 = vsel %vm1109_vm14, %v1097_v37, 0 }
 0x1a2   : > { %v3029_v32 = vpop.permute.xlu0 %803  ;;  %v837_v23 = vrot.slane %v3032_v49, 4  ;;  %v735_v54 = vadd.f32 %v732_v26, %v665_v47  ;;  %v1096_v26 = vld [vmem:[%s3225_s4] sm:$0xf] }
 0x1a3   : > { %v807_v8 = vrot.slane %v3029_v32, 4 }
 0x1a4   : > { %v838_v42 = vsel %vm808_vm10, %v837_v23, %v3032_v49  ;;  %v612_v49 = vadd.f32 %v3018_v38, %v526_v34 }
 0x1a5   : > { %v809_v52 = vsel %vm808_vm10, %v807_v8, %v3029_v32  ;;  %v842_v55 = vadd.f32 %v838_v42, %v758_v48  ;;  %v3114_v42 = vand.u32 4294901760, %v1111_v39 }
 0x1a6   : > { %v696_v56 = vadd.f32 %v3022_v41, %v612_v49  ;;  %v813_v32 = vadd.f32 %v809_v52, %v735_v54 }
 0x1a7   : > { %v3040_v60 = vpop.permute.xlu1 %917  ;;  %v3042_v61 = vpop.permute.xlu0 %887 }
 0x1a8   : > { %v921_v33 = vrot.slane %v3040_v60, 4  ;;  %v891_v35 = vrot.slane %v3042_v61, 4  ;;  %v759_v4 = vadd.f32 %v754_v18, %v696_v56 }
 0x1aa   : > { %v922_v53 = vsel %vm892_vm11, %v921_v33, %v3040_v60  ;;  %v893_v45 = vsel %vm892_vm11, %v891_v35, %v3042_v61  ;;  %v582_v61 = vadd.f32 %v3016_v36, %v496_v57 }
 0x1ab   : > { %v836_v14 = vpop.permute.xlu1 %835  ;;  %v3051_v43 = vpop.permute.xlu0 %805  ;;  %v926_v58 = vadd.f32 %v922_v53, %v842_v55  ;;  %v897_v5 = vadd.f32 %v893_v45, %v813_v32 }
 0x1ac   : > { %v839_v0 = vsel %vm808_vm10, %v837_v23, %v836_v14  ;;  %v666_v10 = vadd.f32 %v3020_v30, %v582_v61  ;;  %v810_v12 = vsel %vm808_vm10, %v807_v8, %v3051_v43 }
 0x1ad   : > { %v843_v11 = vadd.f32 %v839_v0, %v759_v4 }
 0x1ae   : > { %v736_v18 = vadd.f32 %v731_v22, %v666_v10 }
 0x1af   : > { %v1002_v15 = vpop.permute.xlu1 %1001  ;;  %v3063_v27 = vpop.permute.xlu0 %971 }
 0x1b0   : > { %v1005_v40 = vrot.slane %v1002_v15, 4  ;;  %v975_v44 = vrot.slane %v3063_v27, 4  ;;  %v814_v23 = vadd.f32 %v810_v12, %v736_v18 }
 0x1b2   : > { %v1006_v31 = vsel %vm976_vm12, %v1005_v40, %v1002_v15  ;;  %v977_v38 = vsel %vm976_vm12, %v975_v44, %v3063_v27 }
 0x1b3   : > { %v920_v50 = vpop.permute.xlu1 %919  ;;  %v890_v51 = vpop.permute.xlu0 %889  ;;  %v1010_v6 = vadd.f32 %v1006_v31, %v926_v58  ;;  %v981_v14 = vadd.f32 %v977_v38, %v897_v5 }
 0x1b4   : > { %v923_v28 = vsel %vm892_vm11, %v921_v33, %v920_v50  ;;  %v894_v19 = vsel %vm892_vm11, %v891_v35, %v890_v51  ;;  %v2065_v33 = vld [vmem:[%s3227_s6] sm:$0xf]  ;;  %v1594_v35 = vsel %vm1109_vm14, %v1096_v26, 0 }
 0x1b5   : > { %v927_v9 = vadd.f32 %v923_v28, %v843_v11  ;;  %v898_v27 = vadd.f32 %v894_v19, %v814_v23  ;;  %v3119_v46 = vand.u32 4294901760, %v1594_v35 }
 0x1b7   : > { %v1086_v63 = vpop.permute.xlu1 %1085  ;;  %v1056_v60 = vpop.permute.xlu0 %1055  ;;  %v3123_v48 = vsub.f32 %v1594_v35, %v3119_v46 }
 0x1b8   : > { %v1089_v1 = vrot.slane %v1086_v63, 4  ;;  %v1059_v3 = vrot.slane %v1056_v60, 4 }
 0x1b9   : > { %v1669_v49 = vand.u32 4294901760, %v3123_v48 }
 0x1ba   : > { %v1090_v41 = vsel %vm1060_vm13, %v1089_v1, %v1086_v63  ;;  %v1061_v7 = vsel %vm1060_vm13, %v1059_v3, %v1056_v60 }
 0x1bb   : > { %v1094_v62 = vadd.f32 %v1090_v41, %v1010_v6  ;;  %v1004_v16 = vpop.permute.xlu1 %1003  ;;  %v974_v17 = vpop.permute.xlu0 %973  ;;  %v1065_v20 = vadd.f32 %v1061_v7, %v981_v14  ;;  %v1670_v60 = vsub.f32 %v3123_v48, %v1669_v49 }
 0x1bc   : > { %v1007_v36 = vsel %vm976_vm12, %v1005_v40, %v1004_v16  ;;  %v978_v13 = vsel %vm976_vm12, %v975_v44, %v974_v17  ;;  %v3117_v40 = vsub.f32 %v1111_v39, %v3114_v42 }
 0x1bd   : > { %v1100_v21 = vcombine.high %v1094_v62, %v1094_v62  ;;  %v1011_v24 = vadd.f32 %v1007_v36, %v927_v9  ;;  %v1584_v59 = vcombine.high %v1065_v20, %v1065_v20  ;;  %v982_v29 = vadd.f32 %v978_v13, %v898_v27 }
 0x1be   : > { %v1186_v47 = vand.u32 4294901760, %v3117_v40  ;;  %v1671_v41 = vand.u32 4294901760, %v1670_v60 }
 0x1bf   : > { %v1088_v25 = vpop.permute.xlu1 %1087  ;;  %1103 = vrot.lane.b32.xlu0 %v1100_v21, %s2554_s14  ;;  %v1058_v30 = vpop.permute.xlu0 %1057 }
 0x1c0   : > { %v1091_v15 = vsel %vm1060_vm13, %v1089_v1, %v1088_v25  ;;  %v1062_v22 = vsel %vm1060_vm13, %v1059_v3, %v1058_v30  ;;  %v1187_v44 = vsub.f32 %v3117_v40, %v1186_v47 }
 0x1c1   : > { %v1095_v43 = vadd.f32 %v1091_v15, %v1011_v24  ;;  %v1066_v8 = vadd.f32 %v1062_v22, %v982_v29 }
 0x1c2   : > { %v1188_v63 = vand.u32 4294901760, %v1187_v44 }
 0x1c3   : > { %1105 = vrot.lane.b32.xlu1 %v1095_v43, %s2554_s14  ;;  %1587 = vrot.lane.b32.xlu0 %v1584_v59, %s2554_s14 }
 0x1c7   : > { %1589 = vrot.lane.b32.xlu1 %v1066_v8, %s2554_s14  ;;  %1101 = vrot.lane.b32.xlu0 %v1094_v62, %s2554_s14 }
 0x1cb   : > { %1585 = vrot.lane.b32.xlu1 %v1065_v20, %s2554_s14  ;;  %2068 = vperm.xlu0 %2367, %v2065_v33  }
 0x231   : > { %v1104_v34 = vpop.permute.xlu0 %1103 }
 0x235   : > { %v1106_v50 = vpop.permute.xlu1 %1105  ;;  %v1588_v51 = vpop.permute.xlu0 %1587 }
 0x236   : > { %v1108_v52 = vsel %vm1047_vm6, %v1104_v34, %v1106_v50 }
 0x237   : > { %v1115_v53 = vsel %vm489_vm8, %v1108_v52, 0 }
 0x238   : > { %v3131_v54 = vand.u32 4294901760, %v1115_v53 }
 0x239   : > { %v1590_v55 = vpop.permute.xlu1 %1589  ;;  %v1102_v45 = vpop.permute.xlu0 %1101 }
 0x23a   : > { %v1196_v31 = vsub.f32 %v1115_v53, %v3131_v54  ;;  %v1592_v57 = vsel %vm1047_vm6, %v1588_v51, %v1590_v55  ;;  %v1107_v56 = vsel %vm1047_vm6, %v1102_v45, %v1104_v34  ;;  %1118 = vmatprep.subr.mxu1 %v3131_v54 }
 0x23b   : > { %v1598_v32 = vsel %vm489_vm8, %v1592_v57, 0  ;;  %v1113_v58 = vsel %vm489_vm8, %v1107_v56, 0 }
 0x23c   : > { %v1600_v0 = vand.u32 4294901760, %v1598_v32  ;;  %v1119_v38 = vand.u32 4294901760, %v1113_v58  ;;  %v1197_v1 = vand.u32 4294901760, %v1196_v31 }
 0x23d   : > { %v1586_v3 = vpop.permute.xlu1 %1585 }
 0x23e   : > { %v1679_v61 = vsub.f32 %v1598_v32, %v1600_v0  ;;  %v1202_v4 = vsub.f32 %v1113_v58, %v1119_v38  ;;  %v1591_v5 = vsel %vm1047_vm6, %v1586_v3, %v1588_v51  ;;  %1120 = vmatpush1.msra.mxu1 %v1119_v38  ;;  %1601 = vmatprep.subr.mxu0 %v1600_v0 }
 0x23f   : > { %v1596_v6 = vsel %vm489_vm8, %v1591_v5, 0  ;;  %1189 = vmatmul.mubr.f32.vlgmr.msra.gmra.mrb[0].mxu1 %v1188_v63  ;;  %v1198_v28 = vsub.f32 %v1196_v31, %v1197_v1 }
 0x240   : > { %v1203_v7 = vand.u32 4294901760, %v1202_v4  ;;  %v1602_v10 = vand.u32 4294901760, %v1596_v6  ;;  %1269 = vmatprep.mubr.f32.mxu1 %v2540_v2  ;;  %v1680_v11 = vand.u32 4294901760, %v1679_v61 }
 0x241   : > { %v1199_v14 = vand.u32 4294901760, %v1198_v28 }
 0x242   : > { %v1685_v62 = vsub.f32 %v1596_v6, %v1602_v10  ;;  %1603 = vmatpush1.msra.mxu0 %v1602_v10  ;;  %v1204_v16 = vsub.f32 %v1202_v4, %v1203_v7  ;;  %v1681_v17 = vsub.f32 %v1679_v61, %v1680_v11 }
 0x243   : > { %1200 = vmatprep.subr.mxu1 %v1199_v14  ;;  %1672 = vmatmul.mubr.f32.vlgmr.msra.gmra.mrb[0].mxu0 %v1671_v41 }
 0x244   : > { %v1686_v12 = vand.u32 4294901760, %v1685_v62  ;;  %v1205_v36 = vand.u32 4294901760, %v1204_v16  ;;  %v1682_v18 = vand.u32 4294901760, %v1681_v17  ;;  %1752 = vmatprep.mubr.f32.mxu0 %v2540_v2 }
 0x246   : > { %1206 = vmatpush1.msra.mxu1 %v1205_v36  ;;  %1683 = vmatprep.subr.mxu0 %v1682_v18  ;;  %v1687_v9 = vsub.f32 %v1685_v62, %v1686_v12 }
 0x247   : > { %1271 = vmatmul.mubr.f32.vlgmr.msra.gmra.mrb[0].mxu1 %v3114_v42  ;;  %1279 = vmatprep.subr.mxu1 %v1196_v31 }
 0x248   : > { %1282 = vmatpush1.msra.mxu1 %v1202_v4  ;;  %v1688_v20 = vand.u32 4294901760, %v1687_v9  ;;  %1345 = vmatprep.mubr.f32.mxu1 %v2540_v2 }
 0x249   : > { %1355 = vmatprep.subr.mxu1 %v3131_v54 }
 0x24a   : > { %1689 = vmatpush1.msra.mxu0 %v1688_v20  ;;  %v2069_v30 = vpop.permute.xlu0 %2068 }
 0x24b   : > { %1754 = vmatmul.mubr.f32.vlgmr.msra.gmra.mrb[0].mxu0 %v3119_v46  ;;  %1762 = vmatprep.subr.mxu0 %v1679_v61 }
 0x24c   : > { %1765 = vmatpush1.msra.mxu0 %v1685_v62  ;;  %1828 = vmatprep.mubr.f32.mxu0 %v2540_v2 }
 0x24d   : > { %1838 = vmatprep.subr.mxu0 %v1600_v0 }
 0x24f   : > { %1348 = vmatmul.mubr.f32.vlgmr.msra.gmra.mrb[0].mxu1 %v3117_v40 }
 0x250   : > { %1357 = vmatpush1.msra.mxu1 %v1119_v38  ;;  %1420 = vmatprep.mubr.f32.mxu1 %v2540_v2 }
 0x251   : > { %1433 = vmatprep.subr.mxu1 %v1197_v1 }
 0x253   : > { %1831 = vmatmul.mubr.f32.vlgmr.msra.gmra.mrb[0].mxu0 %v3123_v48 }
 0x254   : > { %1840 = vmatpush1.msra.mxu0 %v1602_v10  ;;  %1903 = vmatprep.mubr.f32.mxu0 %v2540_v2 }
 0x255   : > { %1916 = vmatprep.subr.mxu0 %v1680_v11 }
 0x257   : > { %1424 = vmatmul.mubr.f32.vlgmr.msra.gmra.mrb[0].mxu1 %v1186_v47 }
 0x258   : > { %1437 = vmatpush1.msra.mxu1 %v1203_v7  ;;  %1500 = vmatprep.mubr.f32.mxu1 %v2540_v2 }
 0x259   : > { %1509 = vmatprep.subr.mxu1 %v3131_v54 }
 0x25b   : > { %1907 = vmatmul.mubr.f32.vlgmr.msra.gmra.mrb[0].mxu0 %v1669_v49 }
 0x25c   : > { %1920 = vmatpush1.msra.mxu0 %v1686_v12  ;;  %1983 = vmatprep.mubr.f32.mxu0 %v2540_v2 }
 0x25d   : > { %1992 = vmatprep.subr.mxu0 %v1600_v0 }
 0x25f   : > { %1502 = vmatmul.mubr.f32.vlgmr.msra.gmra.mrb[0].mxu1 %v3114_v42 }
 0x260   : > { %1511 = vmatpush1.msra.mxu1 %v1119_v38  ;;  %1574 = vmatprep.mubr.f32.mxu1 %v2540_v2 }
 0x263   : > { %1985 = vmatmul.mubr.f32.vlgmr.msra.gmra.mrb[0].mxu0 %v3119_v46 }
 0x264   : > { %1994 = vmatpush1.msra.mxu0 %v1602_v10  ;;  %2057 = vmatprep.mubr.f32.mxu0 %v2540_v2 }
 0x267   : > { %1576 = vmatmul.mubr.f32.vlgmr.msra.gmra.mrb[0].mxu1 %v3114_v42 }
 0x26b   : > { %2059 = vmatmul.mubr.f32.vlgmr.msra.gmra.mrb[0].mxu0 %v3119_v46 }
 0x33a   : > { %v1577_v21 = vpop.f32.mrb[0].mxu1 }
 0x33b   : > { %v1579_v19 = vpop.f32.mrb[1].mxu1 }
 0x33e   : > { %v2060_v23 = vpop.f32.mrb[0].mxu0 }
 0x33f   : > { %v2246_v24 = vadd.f32 %v2060_v23, %v1577_v21  ;;  %v2062_v25 = vpop.f32.mrb[1].mxu0 }
 0x340   : > { %v2247_v13 = vadd.f32 %v2062_v25, %v1579_v19 }
 0x341   : > { %v2071_v15 = vadd.f32 %v2246_v24, %v2069_v30 }
 0x342   : > { %v2072_v27 = vadd.f32 %v2247_v13, %v2069_v30 }
 0x343   : > { %v2073_v43 = vsel %vm489_vm8, %v2071_v15, 0.0 }
 0x344   : > { %v2074_v59 = vsel %vm489_vm8, %v2072_v27, 0.0 }
 0x345   : > { %v2075_v22 = vadd.f32 %v2074_v59, %v2073_v43 }
 0x347   : > { %2076 = vadd.xlane.f32.xlu1 %v2075_v22 }
 0x3d4   : > { %v2077_v2 = vpop.xlane.xlu1 %2076 }
 0x3d5   : > { %v2078_v29 = vmul.f32 0.00390625, %v2077_v2 }
 0x3d7   : > { %v2079_v8 = vsub.f32 %v2071_v15, %v2078_v29  ;;  %v2080_v33 = vsub.f32 %v2072_v27, %v2078_v29 }
 0x3d9   : > { %v2081_v37 = vmul.f32 %v2079_v8, %v2079_v8  ;;  %v2082_v39 = vmul.f32 %v2080_v33, %v2080_v33 }
 0x3db   : > { %v2083_v26 = vsel %vm489_vm8, %v2081_v37, 0.0  ;;  %v2084_v42 = vsel %vm489_vm8, %v2082_v39, 0.0 }
 0x3dc   : > { %v2085_v35 = vadd.f32 %v2084_v42, %v2083_v26 }
 0x3de   : > { %2086 = vadd.xlane.f32.xlu0 %v2085_v35 }
 0x46b   : > { %v2087_v40 = vpop.xlane.xlu0 %2086 }
 0x46c   : > { %v2088_v46 = vmul.f32 0.00390625, %v2087_v40 }
 0x46e   : > { %v2089_v34 = vadd.f32 1e-05, %v2088_v46 }
 0x470   : > { %2369 = vrsqrt.f32 %v2089_v34 }
 0x47a   : > { %v2370_v47 = vpop.eup %2369 }
 0x47b   : > { %v2091_v48 = vmul.f32 %v2370_v47, %v2079_v8  ;;  %v2092_v50 = vmul.f32 %v2370_v47, %v2080_v33 }
 0x47d   : > { %v2095_v51 = vcombine.low %v2091_v48, %v2092_v50 }
 0x47f   : > { %2097 = vst [vmem:[%s371_s21] sm:$0xff] %v2095_v51 }
 0x480   : > { %2472 = shalt.err (!%p2469_p4)
}
 0x481   : > { %s2473_s5 = scalar_lea.hbm %s3177_s11, 128  ;;  %s2477_s23 = scalar_lea.hbm %s3229_s8, 256 }
 0x482   : > { %p2474_p9 = scmp.ne.s32.totalorder %s3177_s11, %s2473_s5  ;;  %p2478_p8 = scmp.lt.u32.totalorder %s3177_s11, %s3229_s8 }
 0x483   : > { %p2479_p11 = scmp.lt.u32.totalorder %s2477_s23, %s2473_s5  ;;  %p2481_p13 = scmp.lt.u32.totalorder %s2473_s5, %s3177_s11 }
 0x484   : > { %p2475_p12 = pnand %p2474_p9, %p3259_p0 }
 0x485   : > { %p2480_p3 = por %p2479_p11, %p2478_p8 }
 0x486   : > { %p2476_p6 = pneg %p2475_p12 }
 0x487   : > { %p2482_p5 = por %p2481_p13, %p2480_p3 }
 0x489   : > { %p2483_p10 = pnand %p2482_p5, %p2476_p6 }
 0x48b   : > { %2486 = shalt.err (!%p2483_p10)
}
 0x48c   : > { %2276 = dma.vmem_to_hbm [thread:$0]  (%p3259_p0), %s3179_s13, 128, %s3177_s11, %s2099_s16  }
 0x48d PF: > { %s3260_s12 = sld [smem:[#allocation16_spill]]  ;;  %s2125_s24 = sand.u32 1, %s2521_s27  }
 0x48e   : > { %p3262_p2 = scmp.ge.s32.totalorder %s2533_s30, 2  ;;  %s2126_s10 = scalar_lea.sflag [#allocation6], %s2125_s24 }
 0x493   : > { %p3261_p1 = scmp.ne.s32.totalorder %s3260_s12, 0 }
 0x495   : > { %p2290_p7 = pnand %p3262_p2, %p3261_p1 }
 0x497   : > { %2516 = dma.done.wait (!%p2290_p7), %s2126_s10, 128  }
 0x498   : > { %2518 = vsyncadd (!%p2290_p7), %s2126_s10, 4294967168  ;;  %s3263_s30 = sld [smem:[#allocation17_spill]]  ;;  %s3264_s21 = sld [smem:[#allocation15_spill]] }
 0x499   : > { %s3265_s29 = sld [smem:[#allocation18_spill]]  ;;  %s3266_s27 = smov %s2525_s28 }
 0x49e   : > { %p24_p4 = scmp.ge.s32.totalorder %s3263_s30, 4   ;;  %s3267_s28 = smov %s3264_s21 }
 0x4a0   :  { %26 = sbr.rel (!%p24_p4) target bundleno = 9 (0x9), region = 122 }
 0x4a7   :  { %2131 = vsyncpa [#allocation5], 1 }
 0x4a8   :  { %2133 = vsyncpa [#allocation5 + $0x1], 1 }
 0x4a9   :  { %2134 = vsyncpa [#allocation8], 1 }
 0x4aa   :  { %2136 = vsyncpa [#allocation8 + $0x1], 1 }
 0x4ab   :  { %2137 = vsyncpa [#allocation6], 1 }
 0x4ac   :  { %2139 = vsyncpa [#allocation6 + $0x1], 1 }

</bundles_post_ra>
